<compile_context>
chip_gen: v6e
topology: v6e:2x2x1
jax: 0.10.0
libtpu: 0.0.40
codegen_flags: <defaults>
</compile_context>

<pallas_src>
import numpy as np
import jax
import jax.numpy as jnp
from jax import lax
from jax.experimental import pallas as pl
from jax.experimental.pallas import tpu as pltpu


# ----- equivalents of gpnpytorchtools.utils helpers (assumed semantics) -----
def generate_layer_sizes(in_size, out_size, n_layers, how="linspace"):
    if how == "logspace":
        s = np.logspace(np.log10(in_size), np.log10(out_size), n_layers + 1)
    else:
        s = np.linspace(in_size, out_size, n_layers + 1)
    return [int(round(float(v))) for v in s]


_SQRT_HALF = np.float32(1.0 / np.sqrt(2.0))
_EXP_HALF = np.float32(np.exp(0.5))


def _gelu(x):
    # exact (erf-based) GELU, matching torch.nn.GELU() default
    return 0.5 * x * (1.0 + lax.erf(x * _SQRT_HALF))


def _identity(x):
    return x


# --------------------------- host-side weight packing -----------------------
def pack_head_weights(z_mu_w, z_logvar_w, y_mu_w, y_logvar_w, trend_w):
    """Pack the 5 parallel heads that all consume the encoder output.

    Layer 0 is concatenated along the output (N) axis; deeper layers are
    block-diagonal.  Returns (packed_weights, gelu_start_cols) where
    gelu_start_cols[l] is the first output column belonging to the trend head
    at layer l (GELU is applied to columns >= that index, Identity before it).
    """
    stacks = (z_mu_w, z_logvar_w, y_mu_w, y_logvar_w, trend_w)
    depth = len(z_mu_w)
    # TODO(synk): packing assumes resample_layers == regressor_layers (true for
    # the reference config); unequal depths would need per-head tail matmuls.
    assert all(len(s) == depth for s in stacks), (
        "head packing assumes equal depth for resample and regressor heads")
    packed, gelu_starts = [], []
    for l in range(depth):
        blocks = [s[l] for s in stacks]
        out_w = [int(b.shape[1]) for b in blocks]
        gelu_starts.append(int(sum(out_w[:4])))
        if l == 0:
            packed.append(jnp.concatenate(blocks, axis=1))
        else:
            rows = []
            for bi, b in enumerate(blocks):
                row = [b if bj == bi else
                       jnp.zeros((int(b.shape[0]), out_w[bj]), jnp.float32)
                       for bj in range(len(blocks))]
                rows.append(jnp.concatenate(row, axis=1))
            packed.append(jnp.concatenate(rows, axis=0))
    return packed, tuple(gelu_starts)


# --------------------------------- kernel ------------------------------------
def make_ssvaer_kernel(n_enc, n_head, n_lg_rest, n_dec, gelu_starts,
                       latent, input_size, tb, slab_width):
    L, D = latent, input_size
    out_widths = (D, L, L, L, 1, 1, 1, 1, L, L, D)  # slab column layout
    total = sum(out_widths)

    def kernel(*refs):
        it = iter(refs)
        x_ref = next(it)
        enc_w = [next(it) for _ in range(n_enc)]
        head_w = [next(it) for _ in range(n_head)]
        lg_r0 = next(it)
        lg_r1 = next(it)
        lg_rest = [next(it) for _ in range(n_lg_rest)]
        dec_w = [next(it) for _ in range(n_dec)]
        eps_z = next(it)[...]
        eps_y = next(it)[...]
        eps_zg = next(it)[...]
        out_ref = next(it)

        # -------- shared encoder (GELU MLP) --------
        h = x_ref[...]
        for w in enc_w:
            h = _gelu(jnp.dot(h, w[...], preferred_element_type=jnp.float32))

        # -------- fused heads: one packed matmul per layer --------
        # Columns >= gelu_starts[l] belong to the trend head (GELU activation);
        # the other four heads use Identity.
        for l, w in enumerate(head_w):
            raw = jnp.dot(h, w[...], preferred_element_type=jnp.float32)
            cols = lax.broadcasted_iota(jnp.int32, raw.shape, 1)
            h = jnp.where(cols >= gelu_starts[l], _gelu(raw), raw)

        z_mu = h[:, 0:L]
        z_logvar = h[:, L:2 * L]
        y_mu = h[:, 2 * L:2 * L + 1]
        y_logvar = h[:, 2 * L + 1:2 * L + 2]
        dy_mu = h[:, 2 * L + 2:2 * L + 3]

        # -------- reparameterizations --------
        z_res = z_mu + eps_z * jnp.exp(0.5 * z_logvar)
        y_res = y_mu + eps_y * jnp.exp(0.5 * y_logvar)

        # -------- latent generator --------
        # First layer has in_features=2 on cat([y_res, dy_mu], dim=1); use
        # linearity instead of a width-2 lane concat:
        # cat([a, b]) @ W == a * W[0] + b * W[1], with W's rows passed as
        # separate (1, n) arrays from the wrapper.
        g = _gelu(y_res * lg_r0[...] + dy_mu * lg_r1[...])
        for w in lg_rest:
            g = _gelu(jnp.dot(g, w[...], preferred_element_type=jnp.float32))
        z_gen = g
        z_gen_res = z_gen + eps_zg * _EXP_HALF   # reparam with logvar == 1
        # (.detach() is a no-op in the forward pass)

        # -------- decoder, run ONCE on both latents stacked along batch ------
        d = jnp.concatenate([z_res, z_gen_res], axis=0)
        for w in dec_w:
            d = _gelu(jnp.dot(d, w[...], preferred_element_type=jnp.float32))
        x_hat = d[0:tb]
        x_gen_hat = d[tb:2 * tb]

        # -------- single lane-dense output slab --------
        pieces = (x_hat, z_mu, z_logvar, z_res, y_mu, y_logvar, y_res, dy_mu,
                  z_gen, z_gen_res, x_gen_hat)
        c = 0
        for v in pieces:
            w = v.shape[1]
            out_ref[:, c:c + w] = v
            c += w
        if slab_width > total:
            out_ref[:, total:slab_width] = jnp.zeros(
                (tb, slab_width - total), jnp.float32)

    return kernel


# --------------------------------- wrapper -----------------------------------
def ssvaer_forward(x, params, eps_z, eps_y, eps_zgen, *, tb=None):
    enc = list(params["enc"])
    dec = list(params["dec"])
    lg = list(params["latent_gen"])
    head_w, gelu_starts = pack_head_weights(
        params["z_mu"], params["z_logvar"],
        params["y_mu"], params["y_logvar"], params["trend"])

    # Split the (2, n) first latent-gen layer into two (1, n) broadcast rows
    # so the kernel never does width-1 sublane extracts.
    lg_r0 = lg[0][0:1, :]
    lg_r1 = lg[0][1:2, :]
    lg_rest = lg[1:]

    B, D = x.shape
    L = int(params["z_mu"][-1].shape[1])

    if tb is None:
        tb = B
        for cand in (512, 256, 128, 64, 32, 16, 8):
            if B % cand == 0:
                tb = cand
                break
    assert B % tb == 0, "batch must be divisible by the batch tile"

    widths = (D, L, L, L, 1, 1, 1, 1, L, L, D)
    total = sum(widths)
    slab_w = ((total + 127) // 128) * 128

    weights = (*enc, *head_w, lg_r0, lg_r1, *lg_rest, *dec)
    kernel = make_ssvaer_kernel(
        n_enc=len(enc), n_head=len(head_w), n_lg_rest=len(lg_rest),
        n_dec=len(dec), gelu_starts=gelu_starts,
        latent=L, input_size=D, tb=tb, slab_width=slab_w)

    def batch_spec(feat):
        return pl.BlockSpec((tb, feat), lambda b: (b, 0))

    def resident_spec(w):
        # full-extent block, constant index map -> stays VMEM-resident
        return pl.BlockSpec(tuple(int(s) for s in w.shape), lambda b: (0, 0))

    in_specs = ([batch_spec(D)]
                + [resident_spec(w) for w in weights]
                + [batch_spec(L), batch_spec(1), batch_spec(L)])

    slab = pl.pallas_call(
        kernel,
        grid=(B // tb,),
        out_shape=jax.ShapeDtypeStruct((B, slab_w), jnp.float32),
        in_specs=in_specs,
        out_specs=pl.BlockSpec((tb, slab_w), lambda b: (b, 0)),
        compiler_params=pltpu.CompilerParams(
            dimension_semantics=("parallel",)),
    )(x, *weights, eps_z, eps_y, eps_zgen)

    outs, c = [], 0
    for w in widths:
        outs.append(slab[:, c:c + w])
        c += w
    # (x_hat, z_mu, z_logvar, z_res, y_mu, y_logvar, y_res, dy_mu,
    #  z_gen, z_gen_res, x_gen_hat)
    return tuple(outs)


# ------------------------------- init / reference ----------------------------
def init_linear_stack(key, sizes):
    """PyTorch-Linear-like deterministic init: U(-1/sqrt(fan_in), 1/sqrt(fan_in))."""
    ws = []
    for i in range(len(sizes) - 1):
        key, k = jax.random.split(key)
        bound = 1.0 / np.sqrt(sizes[i])
        ws.append(jax.random.uniform(k, (sizes[i], sizes[i + 1]),
                                     minval=-bound, maxval=bound,
                                     dtype=jnp.float32))
    return key, ws


def ssvaer_reference(x, params, eps_z, eps_y, eps_zgen):
    """Pure-JAX reference mirroring the PyTorch forward (numeric check)."""
    def mlp(h, ws, act):
        for w in ws:
            h = act(h @ w)
        return h
    h = mlp(x, params["enc"], _gelu)
    z_mu = mlp(h, params["z_mu"], _identity)
    z_logvar = mlp(h, params["z_logvar"], _identity)
    z_res = z_mu + eps_z * jnp.exp(0.5 * z_logvar)
    y_mu = mlp(h, params["y_mu"], _identity)
    y_logvar = mlp(h, params["y_logvar"], _identity)
    y_res = y_mu + eps_y * jnp.exp(0.5 * y_logvar)
    dy_mu = mlp(h, params["trend"], _gelu)
    x_hat = mlp(z_res, params["dec"], _gelu)
    lg_in = jnp.concatenate([y_res, dy_mu], axis=1)
    z_gen = mlp(lg_in, params["latent_gen"], _gelu)
    z_gen_res = z_gen + eps_zgen * jnp.exp(0.5 * jnp.ones_like(z_gen))
    x_gen_hat = mlp(z_gen_res, params["dec"], _gelu)
    return (x_hat, z_mu, z_logvar, z_res, y_mu, y_logvar, y_res, dy_mu,
            z_gen, z_gen_res, x_gen_hat)


if __name__ == "__main__":
    # Small config consistent with the module's constructor.
    input_size, shared_layers = 16, 2
    resample_layers, resample_size = 2, 8
    regressor_layers, latent_size = 2, 4

    shared_sizes = generate_layer_sizes(input_size, resample_size, shared_layers, how="logspace")
    resample_sizes = generate_layer_sizes(resample_size, latent_size, resample_layers, how="linspace")
    regressor_sizes = generate_layer_sizes(resample_size, 1, regressor_layers, how="linspace")
    latent_gen_sizes = generate_layer_sizes(2, latent_size, 2)
    decoder_sizes = resample_sizes[::-1] + shared_sizes[::-1]

    key = jax.random.PRNGKey(0)
    params = {}
    key, params["enc"] = init_linear_stack(key, shared_sizes)
    key, params["z_mu"] = init_linear_stack(key, resample_sizes)
    key, params["z_logvar"] = init_linear_stack(key, resample_sizes)
    key, params["y_mu"] = init_linear_stack(key, regressor_sizes)
    key, params["y_logvar"] = init_linear_stack(key, regressor_sizes)
    key, params["trend"] = init_linear_stack(key, regressor_sizes)
    key, params["latent_gen"] = init_linear_stack(key, latent_gen_sizes)
    key, params["dec"] = init_linear_stack(key, decoder_sizes)

    B = 64
    key, kx, kz, ky, kg = jax.random.split(key, 5)
    x = jax.random.normal(kx, (B, input_size), dtype=jnp.float32)
    # reparameterization noise (torch.randn_like equivalents), sampled host-side
    eps_z = jax.random.normal(kz, (B, latent_size), dtype=jnp.float32)
    eps_y = jax.random.normal(ky, (B, 1), dtype=jnp.float32)
    eps_zgen = jax.random.normal(kg, (B, latent_size), dtype=jnp.float32)

    # tb=32 -> grid of 2, exercising the batch-pipelined path at demo size.
    outs = ssvaer_forward(x, params, eps_z, eps_y, eps_zgen, tb=32)
    outs = jax.block_until_ready(outs)

    refs = ssvaer_reference(x, params, eps_z, eps_y, eps_zgen)
    for o, r in zip(outs, refs):
        np.testing.assert_allclose(np.asarray(o), np.asarray(r), rtol=1e-4, atol=1e-5)

    print("KERNEL_OK")
</pallas_src>

<mosaic_0001>
module attributes {stable_mosaic.version = 11 : i64} {
  func.func @kernel(%arg0: i32, %arg1: memref<32x16xf32, #tpu.memory_space<vmem>>, %arg2: memref<16x11xf32, #tpu.memory_space<vmem>>, %arg3: memref<11x8xf32, #tpu.memory_space<vmem>>, %arg4: memref<8x24xf32, #tpu.memory_space<vmem>>, %arg5: memref<24x11xf32, #tpu.memory_space<vmem>>, %arg6: memref<1x3xf32, #tpu.memory_space<vmem>>, %arg7: memref<1x3xf32, #tpu.memory_space<vmem>>, %arg8: memref<3x4xf32, #tpu.memory_space<vmem>>, %arg9: memref<4x6xf32, #tpu.memory_space<vmem>>, %arg10: memref<6x8xf32, #tpu.memory_space<vmem>>, %arg11: memref<8x8xf32, #tpu.memory_space<vmem>>, %arg12: memref<8x11xf32, #tpu.memory_space<vmem>>, %arg13: memref<11x16xf32, #tpu.memory_space<vmem>>, %arg14: memref<32x4xf32, #tpu.memory_space<vmem>>, %arg15: memref<32x1xf32, #tpu.memory_space<vmem>>, %arg16: memref<32x4xf32, #tpu.memory_space<vmem>>, %arg17: memref<32x128xf32, #tpu.memory_space<vmem>>) attributes {dimension_semantics = [#tpu.dimension_semantics<parallel>], iteration_bounds = array<i64: 2>, scalar_prefetch = 0 : i64, scratch_operands = 0 : i64, tpu.core_type = #tpu.core_type<tc>, window_params = [{transform_indices = @transform_0, window_bounds = array<i64: 32, 16>}, {pipeline_mode = #tpu.pipeline_mode<synchronous>, transform_indices = @transform_1, window_bounds = array<i64: 16, 11>}, {pipeline_mode = #tpu.pipeline_mode<synchronous>, transform_indices = @transform_2, window_bounds = array<i64: 11, 8>}, {pipeline_mode = #tpu.pipeline_mode<synchronous>, transform_indices = @transform_3, window_bounds = array<i64: 8, 24>}, {pipeline_mode = #tpu.pipeline_mode<synchronous>, transform_indices = @transform_4, window_bounds = array<i64: 24, 11>}, {pipeline_mode = #tpu.pipeline_mode<synchronous>, transform_indices = @transform_5, window_bounds = array<i64: 1, 3>}, {pipeline_mode = #tpu.pipeline_mode<synchronous>, transform_indices = @transform_6, window_bounds = array<i64: 1, 3>}, {pipeline_mode = #tpu.pipeline_mode<synchronous>, transform_indices = @transform_7, window_bounds = array<i64: 3, 4>}, {pipeline_mode = #tpu.pipeline_mode<synchronous>, transform_indices = @transform_8, window_bounds = array<i64: 4, 6>}, {pipeline_mode = #tpu.pipeline_mode<synchronous>, transform_indices = @transform_9, window_bounds = array<i64: 6, 8>}, {pipeline_mode = #tpu.pipeline_mode<synchronous>, transform_indices = @transform_10, window_bounds = array<i64: 8, 8>}, {pipeline_mode = #tpu.pipeline_mode<synchronous>, transform_indices = @transform_11, window_bounds = array<i64: 8, 11>}, {pipeline_mode = #tpu.pipeline_mode<synchronous>, transform_indices = @transform_12, window_bounds = array<i64: 11, 16>}, {transform_indices = @transform_13, window_bounds = array<i64: 32, 4>}, {transform_indices = @transform_14, window_bounds = array<i64: 32, 1>}, {transform_indices = @transform_15, window_bounds = array<i64: 32, 4>}, {transform_indices = @transform_16, window_bounds = array<i64: 32, 128>}]} {
    %c0 = arith.constant 0 : index
    %c0_0 = arith.constant 0 : index
    %0 = vector.load %arg14[%c0, %c0_0] : memref<32x4xf32, #tpu.memory_space<vmem>>, vector<32x4xf32>
    %c0_1 = arith.constant 0 : index
    %c0_2 = arith.constant 0 : index
    %1 = vector.load %arg15[%c0_1, %c0_2] : memref<32x1xf32, #tpu.memory_space<vmem>>, vector<32x1xf32>
    %c0_3 = arith.constant 0 : index
    %c0_4 = arith.constant 0 : index
    %2 = vector.load %arg16[%c0_3, %c0_4] : memref<32x4xf32, #tpu.memory_space<vmem>>, vector<32x4xf32>
    %c0_5 = arith.constant 0 : index
    %c0_6 = arith.constant 0 : index
    %3 = vector.load %arg1[%c0_5, %c0_6] : memref<32x16xf32, #tpu.memory_space<vmem>>, vector<32x16xf32>
    %c0_7 = arith.constant 0 : index
    %c0_8 = arith.constant 0 : index
    %4 = vector.load %arg2[%c0_7, %c0_8] : memref<16x11xf32, #tpu.memory_space<vmem>>, vector<16x11xf32>
    %cst = arith.constant dense<0.000000e+00> : vector<32x11xf32>
    %5 = tpu.matmul %3, %4, %cst {dimension_numbers = #tpu.dot_dimension_numbers<[1], [0], [0], [1], [0, 0, 1, 1], [], []>} : vector<32x16xf32>, vector<16x11xf32>, vector<32x11xf32> -> vector<32x11xf32>
    %cst_9 = arith.constant 5.000000e-01 : f32
    %6 = vector.broadcast %cst_9 : f32 to vector<32x11xf32>
    %7 = arith.mulf %6, %5 : vector<32x11xf32>
    %cst_10 = arith.constant 0.707106769 : f32
    %8 = vector.broadcast %cst_10 : f32 to vector<32x11xf32>
    %9 = arith.mulf %5, %8 : vector<32x11xf32>
    %10 = math.erf %9 : vector<32x11xf32>
    %cst_11 = arith.constant 1.000000e+00 : f32
    %11 = vector.broadcast %cst_11 : f32 to vector<32x11xf32>
    %12 = arith.addf %11, %10 : vector<32x11xf32>
    %13 = arith.mulf %7, %12 : vector<32x11xf32>
    %c0_12 = arith.constant 0 : index
    %c0_13 = arith.constant 0 : index
    %14 = vector.load %arg3[%c0_12, %c0_13] : memref<11x8xf32, #tpu.memory_space<vmem>>, vector<11x8xf32>
    %cst_14 = arith.constant dense<0.000000e+00> : vector<32x8xf32>
    %15 = tpu.matmul %13, %14, %cst_14 {dimension_numbers = #tpu.dot_dimension_numbers<[1], [0], [0], [1], [0, 0, 1, 1], [], []>} : vector<32x11xf32>, vector<11x8xf32>, vector<32x8xf32> -> vector<32x8xf32>
    %cst_15 = arith.constant 5.000000e-01 : f32
    %16 = vector.broadcast %cst_15 : f32 to vector<32x8xf32>
    %17 = arith.mulf %16, %15 : vector<32x8xf32>
    %cst_16 = arith.constant 0.707106769 : f32
    %18 = vector.broadcast %cst_16 : f32 to vector<32x8xf32>
    %19 = arith.mulf %15, %18 : vector<32x8xf32>
    %20 = math.erf %19 : vector<32x8xf32>
    %cst_17 = arith.constant 1.000000e+00 : f32
    %21 = vector.broadcast %cst_17 : f32 to vector<32x8xf32>
    %22 = arith.addf %21, %20 : vector<32x8xf32>
    %23 = arith.mulf %17, %22 : vector<32x8xf32>
    %c0_18 = arith.constant 0 : index
    %c0_19 = arith.constant 0 : index
    %24 = vector.load %arg4[%c0_18, %c0_19] : memref<8x24xf32, #tpu.memory_space<vmem>>, vector<8x24xf32>
    %cst_20 = arith.constant dense<0.000000e+00> : vector<32x24xf32>
    %25 = tpu.matmul %23, %24, %cst_20 {dimension_numbers = #tpu.dot_dimension_numbers<[1], [0], [0], [1], [0, 0, 1, 1], [], []>} : vector<32x8xf32>, vector<8x24xf32>, vector<32x24xf32> -> vector<32x24xf32>
    %26 = tpu.iota {dimensions = array<i32: 1>} : vector<32x24xi32>
    %c20_i32 = arith.constant 20 : i32
    %27 = vector.broadcast %c20_i32 : i32 to vector<32x24xi32>
    %28 = arith.cmpi sge, %26, %27 : vector<32x24xi32>
    %cst_21 = arith.constant 5.000000e-01 : f32
    %29 = vector.broadcast %cst_21 : f32 to vector<32x24xf32>
    %30 = arith.mulf %29, %25 : vector<32x24xf32>
    %cst_22 = arith.constant 0.707106769 : f32
    %31 = vector.broadcast %cst_22 : f32 to vector<32x24xf32>
    %32 = arith.mulf %25, %31 : vector<32x24xf32>
    %33 = math.erf %32 : vector<32x24xf32>
    %cst_23 = arith.constant 1.000000e+00 : f32
    %34 = vector.broadcast %cst_23 : f32 to vector<32x24xf32>
    %35 = arith.addf %34, %33 : vector<32x24xf32>
    %36 = arith.mulf %30, %35 : vector<32x24xf32>
    %37 = arith.select %28, %36, %25 : vector<32x24xi1>, vector<32x24xf32>
    %c0_24 = arith.constant 0 : index
    %c0_25 = arith.constant 0 : index
    %38 = vector.load %arg5[%c0_24, %c0_25] : memref<24x11xf32, #tpu.memory_space<vmem>>, vector<24x11xf32>
    %cst_26 = arith.constant dense<0.000000e+00> : vector<32x11xf32>
    %39 = tpu.matmul %37, %38, %cst_26 {dimension_numbers = #tpu.dot_dimension_numbers<[1], [0], [0], [1], [0, 0, 1, 1], [], []>} : vector<32x24xf32>, vector<24x11xf32>, vector<32x11xf32> -> vector<32x11xf32>
    %40 = tpu.iota {dimensions = array<i32: 1>} : vector<32x11xi32>
    %c10_i32 = arith.constant 10 : i32
    %41 = vector.broadcast %c10_i32 : i32 to vector<32x11xi32>
    %42 = arith.cmpi sge, %40, %41 : vector<32x11xi32>
    %cst_27 = arith.constant 5.000000e-01 : f32
    %43 = vector.broadcast %cst_27 : f32 to vector<32x11xf32>
    %44 = arith.mulf %43, %39 : vector<32x11xf32>
    %cst_28 = arith.constant 0.707106769 : f32
    %45 = vector.broadcast %cst_28 : f32 to vector<32x11xf32>
    %46 = arith.mulf %39, %45 : vector<32x11xf32>
    %47 = math.erf %46 : vector<32x11xf32>
    %cst_29 = arith.constant 1.000000e+00 : f32
    %48 = vector.broadcast %cst_29 : f32 to vector<32x11xf32>
    %49 = arith.addf %48, %47 : vector<32x11xf32>
    %50 = arith.mulf %44, %49 : vector<32x11xf32>
    %51 = arith.select %42, %50, %39 : vector<32x11xi1>, vector<32x11xf32>
    %52 = vector.extract_strided_slice %51 {offsets = [0, 0], sizes = [32, 4], strides = [1, 1]} : vector<32x11xf32> to vector<32x4xf32>
    %53 = vector.extract_strided_slice %51 {offsets = [0, 4], sizes = [32, 4], strides = [1, 1]} : vector<32x11xf32> to vector<32x4xf32>
    %54 = vector.extract_strided_slice %51 {offsets = [0, 8], sizes = [32, 1], strides = [1, 1]} : vector<32x11xf32> to vector<32x1xf32>
    %55 = vector.extract_strided_slice %51 {offsets = [0, 9], sizes = [32, 1], strides = [1, 1]} : vector<32x11xf32> to vector<32x1xf32>
    %56 = vector.extract_strided_slice %51 {offsets = [0, 10], sizes = [32, 1], strides = [1, 1]} : vector<32x11xf32> to vector<32x1xf32>
    %cst_30 = arith.constant 5.000000e-01 : f32
    %57 = vector.broadcast %cst_30 : f32 to vector<32x4xf32>
    %58 = arith.mulf %57, %53 : vector<32x4xf32>
    %59 = math.exp %58 : vector<32x4xf32>
    %60 = arith.mulf %0, %59 : vector<32x4xf32>
    %61 = arith.addf %52, %60 : vector<32x4xf32>
    %cst_31 = arith.constant 5.000000e-01 : f32
    %62 = vector.broadcast %cst_31 : f32 to vector<32x1xf32>
    %63 = arith.mulf %62, %55 : vector<32x1xf32>
    %64 = math.exp %63 : vector<32x1xf32>
    %65 = arith.mulf %1, %64 : vector<32x1xf32>
    %66 = arith.addf %54, %65 : vector<32x1xf32>
    %c0_32 = arith.constant 0 : index
    %c0_33 = arith.constant 0 : index
    %67 = vector.load %arg6[%c0_32, %c0_33] : memref<1x3xf32, #tpu.memory_space<vmem>>, vector<1x3xf32>
    %68 = vector.broadcast %66 : vector<32x1xf32> to vector<32x3xf32>
    %69 = vector.broadcast %67 : vector<1x3xf32> to vector<32x3xf32>
    %70 = arith.mulf %68, %69 : vector<32x3xf32>
    %c0_34 = arith.constant 0 : index
    %c0_35 = arith.constant 0 : index
    %71 = vector.load %arg7[%c0_34, %c0_35] : memref<1x3xf32, #tpu.memory_space<vmem>>, vector<1x3xf32>
    %72 = vector.broadcast %56 : vector<32x1xf32> to vector<32x3xf32>
    %73 = vector.broadcast %71 : vector<1x3xf32> to vector<32x3xf32>
    %74 = arith.mulf %72, %73 : vector<32x3xf32>
    %75 = arith.addf %70, %74 : vector<32x3xf32>
    %cst_36 = arith.constant 5.000000e-01 : f32
    %76 = vector.broadcast %cst_36 : f32 to vector<32x3xf32>
    %77 = arith.mulf %76, %75 : vector<32x3xf32>
    %cst_37 = arith.constant 0.707106769 : f32
    %78 = vector.broadcast %cst_37 : f32 to vector<32x3xf32>
    %79 = arith.mulf %75, %78 : vector<32x3xf32>
    %80 = math.erf %79 : vector<32x3xf32>
    %cst_38 = arith.constant 1.000000e+00 : f32
    %81 = vector.broadcast %cst_38 : f32 to vector<32x3xf32>
    %82 = arith.addf %81, %80 : vector<32x3xf32>
    %83 = arith.mulf %77, %82 : vector<32x3xf32>
    %c0_39 = arith.constant 0 : index
    %c0_40 = arith.constant 0 : index
    %84 = vector.load %arg8[%c0_39, %c0_40] : memref<3x4xf32, #tpu.memory_space<vmem>>, vector<3x4xf32>
    %cst_41 = arith.constant dense<0.000000e+00> : vector<32x4xf32>
    %85 = tpu.matmul %83, %84, %cst_41 {dimension_numbers = #tpu.dot_dimension_numbers<[1], [0], [0], [1], [0, 0, 1, 1], [], []>} : vector<32x3xf32>, vector<3x4xf32>, vector<32x4xf32> -> vector<32x4xf32>
    %cst_42 = arith.constant 5.000000e-01 : f32
    %86 = vector.broadcast %cst_42 : f32 to vector<32x4xf32>
    %87 = arith.mulf %86, %85 : vector<32x4xf32>
    %cst_43 = arith.constant 0.707106769 : f32
    %88 = vector.broadcast %cst_43 : f32 to vector<32x4xf32>
    %89 = arith.mulf %85, %88 : vector<32x4xf32>
    %90 = math.erf %89 : vector<32x4xf32>
    %cst_44 = arith.constant 1.000000e+00 : f32
    %91 = vector.broadcast %cst_44 : f32 to vector<32x4xf32>
    %92 = arith.addf %91, %90 : vector<32x4xf32>
    %93 = arith.mulf %87, %92 : vector<32x4xf32>
    %cst_45 = arith.constant 1.64872122 : f32
    %94 = vector.broadcast %cst_45 : f32 to vector<32x4xf32>
    %95 = arith.mulf %2, %94 : vector<32x4xf32>
    %96 = arith.addf %93, %95 : vector<32x4xf32>
    %97 = tpu.concatenate %61, %96 in 0 : vector<32x4xf32>, vector<32x4xf32> -> vector<64x4xf32>
    %c0_46 = arith.constant 0 : index
    %c0_47 = arith.constant 0 : index
    %98 = vector.load %arg9[%c0_46, %c0_47] : memref<4x6xf32, #tpu.memory_space<vmem>>, vector<4x6xf32>
    %cst_48 = arith.constant dense<0.000000e+00> : vector<64x6xf32>
    %99 = tpu.matmul %97, %98, %cst_48 {dimension_numbers = #tpu.dot_dimension_numbers<[1], [0], [0], [1], [0, 0, 1, 1], [], []>} : vector<64x4xf32>, vector<4x6xf32>, vector<64x6xf32> -> vector<64x6xf32>
    %cst_49 = arith.constant 5.000000e-01 : f32
    %100 = vector.broadcast %cst_49 : f32 to vector<64x6xf32>
    %101 = arith.mulf %100, %99 : vector<64x6xf32>
    %cst_50 = arith.constant 0.707106769 : f32
    %102 = vector.broadcast %cst_50 : f32 to vector<64x6xf32>
    %103 = arith.mulf %99, %102 : vector<64x6xf32>
    %104 = math.erf %103 : vector<64x6xf32>
    %cst_51 = arith.constant 1.000000e+00 : f32
    %105 = vector.broadcast %cst_51 : f32 to vector<64x6xf32>
    %106 = arith.addf %105, %104 : vector<64x6xf32>
    %107 = arith.mulf %101, %106 : vector<64x6xf32>
    %c0_52 = arith.constant 0 : index
    %c0_53 = arith.constant 0 : index
    %108 = vector.load %arg10[%c0_52, %c0_53] : memref<6x8xf32, #tpu.memory_space<vmem>>, vector<6x8xf32>
    %cst_54 = arith.constant dense<0.000000e+00> : vector<64x8xf32>
    %109 = tpu.matmul %107, %108, %cst_54 {dimension_numbers = #tpu.dot_dimension_numbers<[1], [0], [0], [1], [0, 0, 1, 1], [], []>} : vector<64x6xf32>, vector<6x8xf32>, vector<64x8xf32> -> vector<64x8xf32>
    %cst_55 = arith.constant 5.000000e-01 : f32
    %110 = vector.broadcast %cst_55 : f32 to vector<64x8xf32>
    %111 = arith.mulf %110, %109 : vector<64x8xf32>
    %cst_56 = arith.constant 0.707106769 : f32
    %112 = vector.broadcast %cst_56 : f32 to vector<64x8xf32>
    %113 = arith.mulf %109, %112 : vector<64x8xf32>
    %114 = math.erf %113 : vector<64x8xf32>
    %cst_57 = arith.constant 1.000000e+00 : f32
    %115 = vector.broadcast %cst_57 : f32 to vector<64x8xf32>
    %116 = arith.addf %115, %114 : vector<64x8xf32>
    %117 = arith.mulf %111, %116 : vector<64x8xf32>
    %c0_58 = arith.constant 0 : index
    %c0_59 = arith.constant 0 : index
    %118 = vector.load %arg11[%c0_58, %c0_59] : memref<8x8xf32, #tpu.memory_space<vmem>>, vector<8x8xf32>
    %cst_60 = arith.constant dense<0.000000e+00> : vector<64x8xf32>
    %119 = tpu.matmul %117, %118, %cst_60 {dimension_numbers = #tpu.dot_dimension_numbers<[1], [0], [0], [1], [0, 0, 1, 1], [], []>} : vector<64x8xf32>, vector<8x8xf32>, vector<64x8xf32> -> vector<64x8xf32>
    %cst_61 = arith.constant 5.000000e-01 : f32
    %120 = vector.broadcast %cst_61 : f32 to vector<64x8xf32>
    %121 = arith.mulf %120, %119 : vector<64x8xf32>
    %cst_62 = arith.constant 0.707106769 : f32
    %122 = vector.broadcast %cst_62 : f32 to vector<64x8xf32>
    %123 = arith.mulf %119, %122 : vector<64x8xf32>
    %124 = math.erf %123 : vector<64x8xf32>
    %cst_63 = arith.constant 1.000000e+00 : f32
    %125 = vector.broadcast %cst_63 : f32 to vector<64x8xf32>
    %126 = arith.addf %125, %124 : vector<64x8xf32>
    %127 = arith.mulf %121, %126 : vector<64x8xf32>
    %c0_64 = arith.constant 0 : index
    %c0_65 = arith.constant 0 : index
    %128 = vector.load %arg12[%c0_64, %c0_65] : memref<8x11xf32, #tpu.memory_space<vmem>>, vector<8x11xf32>
    %cst_66 = arith.constant dense<0.000000e+00> : vector<64x11xf32>
    %129 = tpu.matmul %127, %128, %cst_66 {dimension_numbers = #tpu.dot_dimension_numbers<[1], [0], [0], [1], [0, 0, 1, 1], [], []>} : vector<64x8xf32>, vector<8x11xf32>, vector<64x11xf32> -> vector<64x11xf32>
    %cst_67 = arith.constant 5.000000e-01 : f32
    %130 = vector.broadcast %cst_67 : f32 to vector<64x11xf32>
    %131 = arith.mulf %130, %129 : vector<64x11xf32>
    %cst_68 = arith.constant 0.707106769 : f32
    %132 = vector.broadcast %cst_68 : f32 to vector<64x11xf32>
    %133 = arith.mulf %129, %132 : vector<64x11xf32>
    %134 = math.erf %133 : vector<64x11xf32>
    %cst_69 = arith.constant 1.000000e+00 : f32
    %135 = vector.broadcast %cst_69 : f32 to vector<64x11xf32>
    %136 = arith.addf %135, %134 : vector<64x11xf32>
    %137 = arith.mulf %131, %136 : vector<64x11xf32>
    %c0_70 = arith.constant 0 : index
    %c0_71 = arith.constant 0 : index
    %138 = vector.load %arg13[%c0_70, %c0_71] : memref<11x16xf32, #tpu.memory_space<vmem>>, vector<11x16xf32>
    %cst_72 = arith.constant dense<0.000000e+00> : vector<64x16xf32>
    %139 = tpu.matmul %137, %138, %cst_72 {dimension_numbers = #tpu.dot_dimension_numbers<[1], [0], [0], [1], [0, 0, 1, 1], [], []>} : vector<64x11xf32>, vector<11x16xf32>, vector<64x16xf32> -> vector<64x16xf32>
    %cst_73 = arith.constant 5.000000e-01 : f32
    %140 = vector.broadcast %cst_73 : f32 to vector<64x16xf32>
    %141 = arith.mulf %140, %139 : vector<64x16xf32>
    %cst_74 = arith.constant 0.707106769 : f32
    %142 = vector.broadcast %cst_74 : f32 to vector<64x16xf32>
    %143 = arith.mulf %139, %142 : vector<64x16xf32>
    %144 = math.erf %143 : vector<64x16xf32>
    %cst_75 = arith.constant 1.000000e+00 : f32
    %145 = vector.broadcast %cst_75 : f32 to vector<64x16xf32>
    %146 = arith.addf %145, %144 : vector<64x16xf32>
    %147 = arith.mulf %141, %146 : vector<64x16xf32>
    %148 = vector.extract_strided_slice %147 {offsets = [0, 0], sizes = [32, 16], strides = [1, 1]} : vector<64x16xf32> to vector<32x16xf32>
    %149 = vector.extract_strided_slice %147 {offsets = [32, 0], sizes = [32, 16], strides = [1, 1]} : vector<64x16xf32> to vector<32x16xf32>
    %c0_76 = arith.constant 0 : index
    %c0_77 = arith.constant 0 : index
    %150 = vector.load %arg17[%c0_76, %c0_77] : memref<32x128xf32, #tpu.memory_space<vmem>>, vector<32x16xf32>
    tpu.vector_store %arg17[%c0_76, %c0_77], %148 {strides = array<i32>} : memref<32x128xf32, #tpu.memory_space<vmem>>, vector<32x16xf32>,
    %c0_78 = arith.constant 0 : index
    %c16 = arith.constant 16 : index
    %151 = vector.load %arg17[%c0_78, %c16] : memref<32x128xf32, #tpu.memory_space<vmem>>, vector<32x4xf32>
    tpu.vector_store %arg17[%c0_78, %c16], %52 {strides = array<i32>} : memref<32x128xf32, #tpu.memory_space<vmem>>, vector<32x4xf32>,
    %c0_79 = arith.constant 0 : index
    %c20 = arith.constant 20 : index
    %152 = vector.load %arg17[%c0_79, %c20] : memref<32x128xf32, #tpu.memory_space<vmem>>, vector<32x4xf32>
    tpu.vector_store %arg17[%c0_79, %c20], %53 {strides = array<i32>} : memref<32x128xf32, #tpu.memory_space<vmem>>, vector<32x4xf32>,
    %c0_80 = arith.constant 0 : index
    %c24 = arith.constant 24 : index
    %153 = vector.load %arg17[%c0_80, %c24] : memref<32x128xf32, #tpu.memory_space<vmem>>, vector<32x4xf32>
    tpu.vector_store %arg17[%c0_80, %c24], %61 {strides = array<i32>} : memref<32x128xf32, #tpu.memory_space<vmem>>, vector<32x4xf32>,
    %c0_81 = arith.constant 0 : index
    %c28 = arith.constant 28 : index
    %154 = vector.load %arg17[%c0_81, %c28] : memref<32x128xf32, #tpu.memory_space<vmem>>, vector<32x1xf32>
    tpu.vector_store %arg17[%c0_81, %c28], %54 {strides = array<i32>} : memref<32x128xf32, #tpu.memory_space<vmem>>, vector<32x1xf32>,
    %c0_82 = arith.constant 0 : index
    %c29 = arith.constant 29 : index
    %155 = vector.load %arg17[%c0_82, %c29] : memref<32x128xf32, #tpu.memory_space<vmem>>, vector<32x1xf32>
    tpu.vector_store %arg17[%c0_82, %c29], %55 {strides = array<i32>} : memref<32x128xf32, #tpu.memory_space<vmem>>, vector<32x1xf32>,
    %c0_83 = arith.constant 0 : index
    %c30 = arith.constant 30 : index
    %156 = vector.load %arg17[%c0_83, %c30] : memref<32x128xf32, #tpu.memory_space<vmem>>, vector<32x1xf32>
    tpu.vector_store %arg17[%c0_83, %c30], %66 {strides = array<i32>} : memref<32x128xf32, #tpu.memory_space<vmem>>, vector<32x1xf32>,
    %c0_84 = arith.constant 0 : index
    %c31 = arith.constant 31 : index
    %157 = vector.load %arg17[%c0_84, %c31] : memref<32x128xf32, #tpu.memory_space<vmem>>, vector<32x1xf32>
    tpu.vector_store %arg17[%c0_84, %c31], %56 {strides = array<i32>} : memref<32x128xf32, #tpu.memory_space<vmem>>, vector<32x1xf32>,
    %c0_85 = arith.constant 0 : index
    %c32 = arith.constant 32 : index
    %158 = vector.load %arg17[%c0_85, %c32] : memref<32x128xf32, #tpu.memory_space<vmem>>, vector<32x4xf32>
    tpu.vector_store %arg17[%c0_85, %c32], %93 {strides = array<i32>} : memref<32x128xf32, #tpu.memory_space<vmem>>, vector<32x4xf32>,
    %c0_86 = arith.constant 0 : index
    %c36 = arith.constant 36 : index
    %159 = vector.load %arg17[%c0_86, %c36] : memref<32x128xf32, #tpu.memory_space<vmem>>, vector<32x4xf32>
    tpu.vector_store %arg17[%c0_86, %c36], %96 {strides = array<i32>} : memref<32x128xf32, #tpu.memory_space<vmem>>, vector<32x4xf32>,
    %c0_87 = arith.constant 0 : index
    %c40 = arith.constant 40 : index
    %160 = vector.load %arg17[%c0_87, %c40] : memref<32x128xf32, #tpu.memory_space<vmem>>, vector<32x16xf32>
    tpu.vector_store %arg17[%c0_87, %c40], %149 {strides = array<i32>} : memref<32x128xf32, #tpu.memory_space<vmem>>, vector<32x16xf32>,
    %cst_88 = arith.constant 0.000000e+00 : f32
    %161 = vector.broadcast %cst_88 : f32 to vector<32x72xf32>
    %c0_89 = arith.constant 0 : index
    %c56 = arith.constant 56 : index
    %162 = vector.load %arg17[%c0_89, %c56] : memref<32x128xf32, #tpu.memory_space<vmem>>, vector<32x72xf32>
    tpu.vector_store %arg17[%c0_89, %c56], %161 {strides = array<i32>} : memref<32x128xf32, #tpu.memory_space<vmem>>, vector<32x72xf32>,
    return
  }
  func.func @transform_0(%arg0: i32) -> (i32, i32) {
    %c0_i32 = arith.constant 0 : i32
    %c0_i32_0 = arith.constant 0 : i32
    return %arg0, %c0_i32 : i32, i32
  }
  func.func @transform_1(%arg0: i32) -> (i32, i32) {
    %c0_i32 = arith.constant 0 : i32
    %c0_i32_0 = arith.constant 0 : i32
    %c0_i32_1 = arith.constant 0 : i32
    return %c0_i32, %c0_i32_0 : i32, i32
  }
  func.func @transform_2(%arg0: i32) -> (i32, i32) {
    %c0_i32 = arith.constant 0 : i32
    %c0_i32_0 = arith.constant 0 : i32
    %c0_i32_1 = arith.constant 0 : i32
    return %c0_i32, %c0_i32_0 : i32, i32
  }
  func.func @transform_3(%arg0: i32) -> (i32, i32) {
    %c0_i32 = arith.constant 0 : i32
    %c0_i32_0 = arith.constant 0 : i32
    %c0_i32_1 = arith.constant 0 : i32
    return %c0_i32, %c0_i32_0 : i32, i32
  }
  func.func @transform_4(%arg0: i32) -> (i32, i32) {
    %c0_i32 = arith.constant 0 : i32
    %c0_i32_0 = arith.constant 0 : i32
    %c0_i32_1 = arith.constant 0 : i32
    return %c0_i32, %c0_i32_0 : i32, i32
  }
  func.func @transform_5(%arg0: i32) -> (i32, i32) {
    %c0_i32 = arith.constant 0 : i32
    %c0_i32_0 = arith.constant 0 : i32
    %c0_i32_1 = arith.constant 0 : i32
    return %c0_i32, %c0_i32_0 : i32, i32
  }
  func.func @transform_6(%arg0: i32) -> (i32, i32) {
    %c0_i32 = arith.constant 0 : i32
    %c0_i32_0 = arith.constant 0 : i32
    %c0_i32_1 = arith.constant 0 : i32
    return %c0_i32, %c0_i32_0 : i32, i32
  }
  func.func @transform_7(%arg0: i32) -> (i32, i32) {
    %c0_i32 = arith.constant 0 : i32
    %c0_i32_0 = arith.constant 0 : i32
    %c0_i32_1 = arith.constant 0 : i32
    return %c0_i32, %c0_i32_0 : i32, i32
  }
  func.func @transform_8(%arg0: i32) -> (i32, i32) {
    %c0_i32 = arith.constant 0 : i32
    %c0_i32_0 = arith.constant 0 : i32
    %c0_i32_1 = arith.constant 0 : i32
    return %c0_i32, %c0_i32_0 : i32, i32
  }
  func.func @transform_9(%arg0: i32) -> (i32, i32) {
    %c0_i32 = arith.constant 0 : i32
    %c0_i32_0 = arith.constant 0 : i32
    %c0_i32_1 = arith.constant 0 : i32
    return %c0_i32, %c0_i32_0 : i32, i32
  }
  func.func @transform_10(%arg0: i32) -> (i32, i32) {
    %c0_i32 = arith.constant 0 : i32
    %c0_i32_0 = arith.constant 0 : i32
    %c0_i32_1 = arith.constant 0 : i32
    return %c0_i32, %c0_i32_0 : i32, i32
  }
  func.func @transform_11(%arg0: i32) -> (i32, i32) {
    %c0_i32 = arith.constant 0 : i32
    %c0_i32_0 = arith.constant 0 : i32
    %c0_i32_1 = arith.constant 0 : i32
    return %c0_i32, %c0_i32_0 : i32, i32
  }
  func.func @transform_12(%arg0: i32) -> (i32, i32) {
    %c0_i32 = arith.constant 0 : i32
    %c0_i32_0 = arith.constant 0 : i32
    %c0_i32_1 = arith.constant 0 : i32
    return %c0_i32, %c0_i32_0 : i32, i32
  }
  func.func @transform_13(%arg0: i32) -> (i32, i32) {
    %c0_i32 = arith.constant 0 : i32
    %c0_i32_0 = arith.constant 0 : i32
    return %arg0, %c0_i32 : i32, i32
  }
  func.func @transform_14(%arg0: i32) -> (i32, i32) {
    %c0_i32 = arith.constant 0 : i32
    %c0_i32_0 = arith.constant 0 : i32
    return %arg0, %c0_i32 : i32, i32
  }
  func.func @transform_15(%arg0: i32) -> (i32, i32) {
    %c0_i32 = arith.constant 0 : i32
    %c0_i32_0 = arith.constant 0 : i32
    return %arg0, %c0_i32 : i32, i32
  }
  func.func @transform_16(%arg0: i32) -> (i32, i32) {
    %c0_i32 = arith.constant 0 : i32
    %c0_i32_0 = arith.constant 0 : i32
    return %arg0, %c0_i32 : i32, i32
  }
}

</mosaic_0001>

<bundles_post_ra>
// kernel: tpu_custom_call.1
= control target key start
LH: loop header
LB: loop body
LE: loop exit
PB: predicated region body
PF: predicated region fallthrough
CT: control target
= control target key end

     0   :  { %s3680_s0 = inlined_call_operand.vmem [shape: f32[64,16], index: 0, kind: input, shape index: {}]   ;;  %s3681_s1 = inlined_call_operand.vmem [shape: f32[16,11], index: 1, kind: input, shape index: {}]   ;;  %s3682_s2 = inlined_call_operand.vmem [shape: f32[11,8], index: 2, kind: input, shape index: {}]   ;;  %s3683_s3 = inlined_call_operand.vmem [shape: f32[8,24], index: 3, kind: input, shape index: {}]   ;;  %s3684_s4 = inlined_call_operand.vmem [shape: f32[24,11], index: 4, kind: input, shape index: {}]   ;;  %s3685_s5 = inlined_call_operand.vmem [shape: f32[1,3], index: 5, kind: input, shape index: {}]   ;;  %s3686_s6 = inlined_call_operand.vmem [shape: f32[1,3], index: 6, kind: input, shape index: {}]   ;;  %s3687_s7 = inlined_call_operand.vmem [shape: f32[3,4], index: 7, kind: input, shape index: {}]   ;;  %s3688_s8 = inlined_call_operand.vmem [shape: f32[4,6], index: 8, kind: input, shape index: {}]   ;;  %s3689_s9 = inlined_call_operand.vmem [shape: f32[6,8], index: 9, kind: input, shape index: {}]   ;;  %s3690_s10 = inlined_call_operand.vmem [shape: f32[8,8], index: 10, kind: input, shape index: {}]   ;;  %s3691_s11 = inlined_call_operand.vmem [shape: f32[8,11], index: 11, kind: input, shape index: {}]   ;;  %s3692_s12 = inlined_call_operand.vmem [shape: f32[11,16], index: 12, kind: input, shape index: {}]   ;;  %s3693_s13 = inlined_call_operand.vmem [shape: f32[64,4], index: 13, kind: input, shape index: {}]   ;;  %s3694_s14 = inlined_call_operand.vmem [shape: f32[64,1], index: 14, kind: input, shape index: {}]   ;;  %s3695_s15 = inlined_call_operand.vmem [shape: f32[64,4], index: 15, kind: input, shape index: {}]   ;;  %s3696_s16 = inlined_call_operand.hbm [shape: f32[64,128], index: 16, kind: output, shape index: {}]  }
   0x1   :  { %3699 = sst [smem:[#allocation7_spill]] %s3680_s0 }
   0x2   :  { %3700 = sst [smem:[#allocation8_spill]] %s3681_s1 }
   0x3   :  { %3701 = sst [smem:[#allocation9_spill]] %s3682_s2 }
   0x4   :  { %3702 = sst [smem:[#allocation10_spill]] %s3683_s3 }
   0x5   :  { %21 = vsyncpa [#allocation3], 0 }
   0x6   :  { %23 = vsyncpa [#allocation3 + $0x1], 0  ;;  %s3177_s21 = smov 0   ;;  %s3179_s22 = smov 0  }
   0x7   :  { %s3181_s23 = smov 0   ;;  %s3183_s24 = smov 0  }
   0x8 LB: > { %3703 = sst [smem:[#allocation5_spill]] %s3070_s23  ;;  %s3198_s25 = sadd.s32 4294967295, %s3074_s24   ;;  %s3074_s24 = sphi %s3183_s24, %s3716_s24   ;;  %s3070_s23 = sphi %s3181_s23, %s3713_s23   ;;  %s3066_s22 = sphi %s3179_s22, %s3715_s22   ;;  %s3062_s21 = sphi %s3177_s21, %s3714_s21  }
   0x9   : > { %s2528_s26 = sadd.s32 4294967294, %s3074_s24   ;;  %s3202_s27 = sadd.s32 1, %s3074_s24  }
   0xa   : > { %s392_s28 = sadd.s32 1, %s3070_s23  ;;  %s389_s29 = ssub.s32 %s3074_s24, %s3202_s27 }
   0xb   : > { %p402_p0 = scmp.ne.s32.totalorder %s3070_s23, %s3066_s22  ;;  %p390_p1 = scmp.eq.s32.totalorder %s389_s29, 0 }
   0xc   : > { %p403_p2 = scmp.eq.s32.totalorder %s3198_s25, 1  ;;  %p408_p3 = scmp.ne.s32.totalorder %s3066_s22, %s3062_s21 }
   0xd   : > { %p409_p4 = scmp.eq.s32.totalorder %s2528_s26, 1  ;;  %p2531_p7 = scmp.ge.s32.totalorder %s3074_s24, 1 }
   0xe   : > { %s3213_s30 = scalar_select %p390_p1, %s3070_s23, %s392_s28  }
   0xf   : > { %p3215_p5 = por %p403_p2, %p402_p0  ;;  %p3219_p6 = por %p409_p4, %p408_p3 }
  0x10   : > { %3704 = sst [smem:[#allocation6_spill]] %s3213_s30  ;;  %p499_p8 = scmp.lt.s32.totalorder %s3074_s24, 3 }
  0x12   : > { %p500_p9 = pnand %p2531_p7, %p499_p8 }
  0x13   : > { %s3707_s1 = sld [smem:[#allocation8_spill]] (!%p500_p9)  ;;  %s2533_s28 = sshll.u32 (!%p500_p9), %s3198_s25, 2 }
  0x14   : > { %503 = sbr.rel (%p500_p9) target bundleno = 2746 (0xaba), region = 84  ;;  %p565_p10 = scmp.lt.s32.totalorder (!%p500_p9), %s2533_s28, 7 }
  0x15   : > { %s3708_s18 = sld [smem:[#allocation7_spill]] (!%p500_p9)  ;;  %s3698_s23 = smov (!%p500_p9), 8  }
  0x16   : > { %s3709_s2 = sld [smem:[#allocation9_spill]] (!%p500_p9)  ;;  %s3080_s30 = smov (!%p500_p9), 124  }
  0x17   : > { %s3710_s3 = sld [smem:[#allocation10_spill]] (!%p500_p9)  ;;  %s3083_s20 = smov (!%p500_p9), 20  }
  0x19   : > { %v606_v0 = vld [vmem:[%s3707_s1 + $0x8] sm:$0xff]  ;;  %v605_v1 = vld [vmem:[%s3707_s1] sm:$0xff]  ;;  %s3718_s28 = smov (!%p565_p10, %s2533_s28), 7  ;;  %vm607_vm0 = vcmask 130048   ;;  %vm740_vm1 = vcmask 1042432   ;;  %vm727_vm2 = vcmask 89088  }
  0x1a   : > { %2689 = vmatprep.subr.mxu0 %v606_v0  ;;  %s3232_s29 = sshll.u32 %s3718_s28, 3  ;;  %vm850_vm3 = vcmask 64512   ;;  %v977_v57 = vld [vmem:[%s3684_s4 + $0x10] sm:$0xff]  ;;  %v976_v58 = vld [vmem:[%s3684_s4 + $0x8] sm:$0xff]  ;;  %v975_v59 = vld [vmem:[%s3684_s4] sm:$0xff]  ;;  %vm978_vm5 = vcmask 195584  }
  0x1b   : > { %2690 = vmatpush3.msra.mxu0 %v606_v0  ;;  %s568_s19 = scalar_lea.vmem %s3708_s18, %s3232_s29  ;;  %s3077_s18 = smov 119   ;;  %vm1415_vm7 = vcmask 1043456   ;;  %vm1260_vm8 = vcmask 23552   ;;  %vm1390_vm9 = vcmask 31744   ;;  %vm1590_vm10 = vcmask 1045504  }
  0x1c   : > { %2691 = vmatprep.subr.mxu0 %v605_v1  ;;  %v601_v2 = vld [vmem:[%s568_s19] sm:$0xff]  ;;  %v602_v3 = vld [vmem:[%s568_s19 + $0x8] sm:$0xff]  ;;  %v603_v4 = vld [vmem:[%s568_s19 + $0x10] sm:$0xff]  ;;  %s580_s26 = scalar_lea.vmem %s3694_s14, %s3232_s29  ;;  %s3344_s28 = scalar_lea.vmem %s3693_s13, %s3232_s29  ;;  %vm1565_vm11 = vcmask 48128   ;;  %vm2269_vm12 = vcmask 162944   ;;  %vm2274_vm13 = vcmask 195744  }
  0x1d   : > { %2692 = vmatpush3.msra.mxu0 %v605_v1  ;;  %2693 = vmatprep.mubr.msk.f32.mxu0 %vm607_vm0, %v601_v2  ;;  %v604_v5 = vld [vmem:[%s568_s19 + $0x18] sm:$0xff]  ;;  %v726_v6 = vld [vmem:[%s3709_s2 + $0x8] sm:$0x7]  ;;  %v725_v7 = vld [vmem:[%s3709_s2] sm:$0xff]  ;;  %s3081_s19 = smov 16   ;;  %vm2291_vm14 = vcmask 228544  }
  0x1e   : > { %2694 = vmatmul.mubr.msk.f32.vlgmr.msra.gmra.mxu0 %vm607_vm0, %v602_v3  ;;  %2699 = vmatprep.subr.msk.mxu1 %vm740_vm1, %v726_v6  ;;  %v849_v32 = vld [vmem:[%s3710_s3] sm:$0xff]  ;;  %vm2308_vm15 = vcmask 236768  }
  0x1f   : > { %2696 = vmatprep.mubr.msk.f32.mxu0 %vm607_vm0, %v603_v4  ;;  %2700 = vmatpush3.msk.msra.mxu1 %vm740_vm1, %v726_v6  ;;  %v948_v4 = vlaneseq }
  0x20   : > { %2701 = vmatprep.subr.mxu1 %v725_v7  ;;  %2709 = vmatprep.subr.mxu0 %v849_v32 }
  0x21   : > { %2702 = vmatpush3.msra.mxu1 %v725_v7  ;;  %2710 = vmatpush3.msra.mxu0 %v849_v32  ;;  %v3270_v6 = vand.u32 127, %v948_v4  ;;  %v593_v4 = vld [vmem:[%s580_s26] sm:$0xff] }
  0x22   : > { %2697 = vmatmul.mubr.msk.f32.gmra.mxu0 %vm607_vm0, %v604_v5  ;;  %2717 = vmatprep.subr.mxu0 %v977_v57 }
  0x23   : > { %2809 = vmatprep.subr.mxu1 %v977_v57  ;;  %vm950_vm4 = vcmp.ge.s32.totalorder %v3270_v6, 20  ;;  %vm1076_vm6 = vcmp.ge.s32.totalorder %v3270_v6, 10 }
  0xde   : > { %v2695_v8 = vpop.f32.mrf.mxu0 }
  0xdf   : > { %v710_v9 = vmul.f32 0.70710677, %v2695_v8  ;;  %v706_v22 = vmul.f32 0.5, %v2695_v8 }
  0xe0   : > { %v686_v10 = vpop.f32.mrf.mxu0 }
  0xe1   : > { %2878 = verf.f32 %v710_v9  ;;  %v709_v11 = vmul.f32 0.70710677, %v686_v10  ;;  %v705_v19 = vmul.f32 0.5, %v686_v10 }
  0xe2   : > { %v2698_v12 = vpop.f32.mrf.mxu0 }
  0xe3   : > { %2880 = verf.f32 %v709_v11  ;;  %v712_v13 = vmul.f32 0.70710677, %v2698_v12  ;;  %v708_v29 = vmul.f32 0.5, %v2698_v12 }
  0xe4   : > { %v696_v14 = vpop.f32.mrf.mxu0 }
  0xe5   : > { %2882 = verf.f32 %v712_v13  ;;  %v711_v15 = vmul.f32 0.70710677, %v696_v14  ;;  %v707_v27 = vmul.f32 0.5, %v696_v14 }
  0xe7   : > { %2884 = verf.f32 %v711_v15 }
  0xee   : > { %v2879_v16 = vpop.eup %2878 }
  0xef   : > { %v718_v18 = vadd.f32 1.0, %v2879_v16 }
  0xf0   : > { %v2881_v17 = vpop.eup %2880 }
  0xf1   : > { %v717_v20 = vadd.f32 1.0, %v2881_v17  ;;  %v722_v25 = vmul.f32 %v718_v18, %v706_v22 }
  0xf2   : > { %v2883_v21 = vpop.eup %2882 }
  0xf3   : > { %v721_v23 = vmul.f32 %v717_v20, %v705_v19  ;;  %v720_v26 = vadd.f32 1.0, %v2883_v21 }
  0xf4   : > { %v2885_v24 = vpop.eup %2884 }
  0xf5   : > { %v719_v28 = vadd.f32 1.0, %v2885_v24  ;;  %2703 = vmatprep.mubr.msk.f32.mxu1 %vm727_vm2, %v721_v23  ;;  %v724_v31 = vmul.f32 %v720_v26, %v708_v29 }
  0xf6   : > { %2704 = vmatmul.mubr.msk.f32.vlgmr.msra.gmra.mxu1 %vm727_vm2, %v722_v25 }
  0xf7   : > { %v723_v30 = vmul.f32 %v719_v28, %v707_v27  ;;  %2812 = vmatpush3.msra.mxu1 %v977_v57 }
  0xf8   : > { %2810 = vmatprep.subr.mxu1 %v976_v58 }
  0xf9   : > { %2706 = vmatprep.mubr.msk.f32.mxu1 %vm727_vm2, %v723_v30  ;;  %2813 = vmatpush3.msra.mxu1 %v976_v58 }
  0xfa   : > { %2707 = vmatmul.mubr.msk.f32.gmra.mxu1 %vm727_vm2, %v724_v31  ;;  %2811 = vmatprep.subr.mxu1 %v975_v59 }
  0xfb   : > { %2814 = vmatpush3.msra.mxu1 %v975_v59 }
 0x1b6   : > { %v2705_v33 = vpop.f32.mrf.mxu1 }
 0x1b7   : > { %v834_v34 = vmul.f32 0.70710677, %v2705_v33  ;;  %v830_v47 = vmul.f32 0.5, %v2705_v33 }
 0x1b8   : > { %v810_v35 = vpop.f32.mrf.mxu1 }
 0x1b9   : > { %2886 = verf.f32 %v834_v34  ;;  %v833_v36 = vmul.f32 0.70710677, %v810_v35  ;;  %v829_v44 = vmul.f32 0.5, %v810_v35 }
 0x1ba   : > { %v2708_v37 = vpop.f32.mrf.mxu1 }
 0x1bb   : > { %2888 = verf.f32 %v833_v36  ;;  %v836_v38 = vmul.f32 0.70710677, %v2708_v37  ;;  %v832_v54 = vmul.f32 0.5, %v2708_v37 }
 0x1bc   : > { %v820_v39 = vpop.f32.mrf.mxu1 }
 0x1bd   : > { %2890 = verf.f32 %v836_v38  ;;  %v835_v40 = vmul.f32 0.70710677, %v820_v39  ;;  %v831_v52 = vmul.f32 0.5, %v820_v39 }
 0x1bf   : > { %2892 = verf.f32 %v835_v40 }
 0x1c6   : > { %v2887_v41 = vpop.eup %2886 }
 0x1c7   : > { %v842_v43 = vadd.f32 1.0, %v2887_v41 }
 0x1c8   : > { %v2889_v42 = vpop.eup %2888 }
 0x1c9   : > { %v841_v45 = vadd.f32 1.0, %v2889_v42  ;;  %v846_v50 = vmul.f32 %v842_v43, %v830_v47 }
 0x1ca   : > { %v2891_v46 = vpop.eup %2890 }
 0x1cb   : > { %v845_v48 = vmul.f32 %v841_v45, %v829_v44  ;;  %v844_v51 = vadd.f32 1.0, %v2891_v46 }
 0x1cc   : > { %v2893_v49 = vpop.eup %2892 }
 0x1cd   : > { %v843_v53 = vadd.f32 1.0, %v2893_v49  ;;  %2711 = vmatprep.mubr.msk.f32.mxu0 %vm850_vm3, %v845_v48  ;;  %v848_v56 = vmul.f32 %v844_v51, %v832_v54 }
 0x1ce   : > { %2712 = vmatmul.mubr.msk.f32.vlgmr.msra.gmra.mxu0 %vm850_vm3, %v846_v50 }
 0x1cf   : > { %v847_v55 = vmul.f32 %v843_v53, %v831_v52  ;;  %2718 = vmatpush3.msra.mxu0 %v977_v57 }
 0x1d0   : > { %2719 = vmatprep.subr.mxu0 %v976_v58 }
 0x1d1   : > { %2714 = vmatprep.mubr.msk.f32.mxu0 %vm850_vm3, %v847_v55  ;;  %2720 = vmatpush3.msra.mxu0 %v976_v58 }
 0x1d2   : > { %2715 = vmatmul.mubr.msk.f32.gmra.mxu0 %vm850_vm3, %v848_v56  ;;  %2721 = vmatprep.subr.mxu0 %v975_v59 }
 0x1d3   : > { %2722 = vmatpush3.msra.mxu0 %v975_v59 }
 0x28e   : > { %v2713_v60 = vpop.f32.mrf.mxu0 }
 0x28f   : > { %v956_v61 = vmul.f32 0.70710677, %v2713_v60  ;;  %v952_v9 = vmul.f32 0.5, %v2713_v60 }
 0x290   : > { %v929_v62 = vpop.f32.mrf.mxu0 }
 0x291   : > { %2894 = verf.f32 %v956_v61  ;;  %v955_v63 = vmul.f32 0.70710677, %v929_v62  ;;  %v951_v10 = vmul.f32 0.5, %v929_v62 }
 0x292   : > { %v2716_v0 = vpop.f32.mrf.mxu0 }
 0x293   : > { %2896 = verf.f32 %v955_v63  ;;  %v958_v1 = vmul.f32 0.70710677, %v2716_v0  ;;  %v954_v17 = vmul.f32 0.5, %v2716_v0 }
 0x294   : > { %v939_v2 = vpop.f32.mrf.mxu0 }
 0x295   : > { %2898 = verf.f32 %v958_v1  ;;  %v957_v3 = vmul.f32 0.70710677, %v939_v2  ;;  %v953_v18 = vmul.f32 0.5, %v939_v2 }
 0x297   : > { %2900 = verf.f32 %v957_v3  ;;  %v3078_v3 = vmov 8  }
 0x298   : > { %2871 = vset.pattern.permute.xlu0 %v3078_v3 }
 0x29e   : > { %v2895_v5 = vpop.eup %2894 }
 0x29f   : > { %v964_v7 = vadd.f32 1.0, %v2895_v5 }
 0x2a0   : > { %v2897_v8 = vpop.eup %2896 }
 0x2a1   : > { %v963_v11 = vadd.f32 1.0, %v2897_v8  ;;  %v968_v13 = vmul.f32 %v964_v7, %v952_v9  ;;  %v594_v7 = vld [vmem:[%s580_s26 + $0x8] sm:$0xff]  ;;  %v595_v8 = vld [vmem:[%s580_s26 + $0x10] sm:$0xff] }
 0x2a2   : > { %v2899_v12 = vpop.eup %2898 }
 0x2a3   : > { %v967_v14 = vmul.f32 %v963_v11, %v951_v10  ;;  %v966_v15 = vadd.f32 1.0, %v2899_v12  ;;  %v972_v21 = vsel %vm950_vm4, %v968_v13, %v2713_v60  ;;  %v596_v13 = vld [vmem:[%s580_s26 + $0x18] sm:$0xff]  ;;  %s3084_s26 = smov 22  }
 0x2a4   : > { %v2901_v16 = vpop.eup %2900 }
 0x2a5   : > { %v965_v19 = vadd.f32 1.0, %v2901_v16  ;;  %v971_v20 = vsel %vm950_vm4, %v967_v14, %v929_v62  ;;  %v970_v22 = vmul.f32 %v966_v15, %v954_v17  ;;  %v3076_v62 = vmov 10  }
 0x2a6   : > { %2723 = vmatprep.mubr.msk.f32.mxu0 %vm978_vm5, %v971_v20  ;;  %2869 = vset.pattern.permute.xlu1 %v3076_v62 }
 0x2a7   : > { %v969_v23 = vmul.f32 %v965_v19, %v953_v18  ;;  %2724 = vmatmul.mubr.msk.f32.vlgmr.msra.gmra.mxu0 %vm978_vm5, %v972_v21  ;;  %v974_v25 = vsel %vm950_vm4, %v970_v22, %v2716_v0 }
 0x2a9   : > { %v973_v24 = vsel %vm950_vm4, %v969_v23, %v939_v2  ;;  %vm2347_vm4 = vcmask 261368  }
 0x2aa   : > { %2726 = vmatprep.mubr.msk.f32.mxu1 %vm978_vm5, %v973_v24  ;;  %v1389_v24 = vld [vmem:[%s3688_s8] sm:$0xf] }
 0x2ab   : > { %2727 = vmatmul.mubr.msk.f32.vlgmr.msra.gmra.mxu1 %vm978_vm5, %v974_v25  ;;  %2737 = vmatprep.subr.msk.mxu1 %vm1415_vm7, %v1389_v24  ;;  %v1259_v25 = vld [vmem:[%s3687_s7] sm:$0x7]  ;;  %vm2368_vm5 = vcmask 294144  }
 0x2ac   : > { %2729 = vmatprep.subr.msk.mxu0 %vm740_vm1, %v1259_v25  ;;  %2738 = vmatpush3.msk.msra.mxu1 %vm1415_vm7, %v1389_v24 }
 0x2ad   : > { %2730 = vmatpush3.msk.msra.mxu0 %vm740_vm1, %v1259_v25 }
 0x367   : > { %v2725_v26 = vpop.f32.mrf.mxu0 }
 0x368   : > { %v1082_v27 = vmul.f32 0.70710677, %v2725_v26  ;;  %v1078_v35 = vmul.f32 0.5, %v2725_v26 }
 0x369   : > { %v1057_v28 = vpop.f32.mrf.mxu0 }
 0x36a   : > { %2902 = verf.f32 %v1082_v27  ;;  %v1081_v29 = vmul.f32 0.70710677, %v1057_v28  ;;  %v1077_v39 = vmul.f32 0.5, %v1057_v28 }
 0x36b   : > { %v2728_v30 = vpop.f32.mrf.mxu1 }
 0x36c   : > { %2904 = verf.f32 %v1081_v29  ;;  %v1084_v31 = vmul.f32 0.70710677, %v2728_v30  ;;  %v1080_v44 = vmul.f32 0.5, %v2728_v30 }
 0x36d   : > { %v1067_v32 = vpop.f32.mrf.mxu1 }
 0x36e   : > { %2906 = verf.f32 %v1084_v31  ;;  %v1083_v33 = vmul.f32 0.70710677, %v1067_v32  ;;  %v1079_v47 = vmul.f32 0.5, %v1067_v32 }
 0x370   : > { %2908 = verf.f32 %v1083_v33 }
 0x377   : > { %v2903_v34 = vpop.eup %2902 }
 0x378   : > { %v1090_v36 = vadd.f32 1.0, %v2903_v34 }
 0x379   : > { %v2905_v37 = vpop.eup %2904 }
 0x37a   : > { %v1094_v38 = vmul.f32 %v1090_v36, %v1078_v35  ;;  %v1089_v40 = vadd.f32 1.0, %v2905_v37 }
 0x37b   : > { %v2907_v41 = vpop.eup %2906 }
 0x37c   : > { %v3276_v42 = vsel %vm1076_vm6, %v1094_v38, %v2725_v26  ;;  %v1093_v43 = vmul.f32 %v1089_v40, %v1077_v39  ;;  %v1092_v45 = vadd.f32 1.0, %v2907_v41  ;;  %v2559_v26 = vld [vmem:[%s3686_s6] ss:$0 sm:$0xff] }
 0x37d   : > { %v2909_v46 = vpop.eup %2908  ;;  %v1102_v48 = vmul.f32 0.5, %v3276_v42 }
 0x37e   : > { %v3281_v49 = vsel %vm1076_vm6, %v1093_v43, %v1057_v28  ;;  %v1096_v50 = vmul.f32 %v1092_v45, %v1080_v44  ;;  %v1091_v51 = vadd.f32 1.0, %v2909_v46  ;;  %v2558_v28 = vld [vmem:[%s3685_s5] ss:$0 sm:$0xff]  ;;  %v590_v43 = vld [vmem:[%s3344_s28 + $0x8] sm:$0xff] }
 0x37f   : > { %v1101_v52 = vmul.f32 0.5, %v3281_v49  ;;  %v1107_v56 = vmul.f32 1.442695, %v1102_v48 }
 0x380   : > { %v3286_v53 = vsel %vm1076_vm6, %v1096_v50, %v2728_v30  ;;  %v1095_v54 = vmul.f32 %v1091_v51, %v1079_v47  ;;  %v592_v50 = vld [vmem:[%s3344_s28 + $0x18] sm:$0xff] }
 0x381   : > { %v1105_v55 = vmul.f32 1.442695, %v1101_v52  ;;  %v1104_v58 = vmul.f32 0.5, %v3286_v53 }
 0x382   : > { %v3290_v57 = vsel %vm1076_vm6, %v1095_v54, %v1067_v32  ;;  %vm2385_vm6 = vcmask 326944  }
 0x383   : > { %2910 = vpow2.f32 %v1105_v55  ;;  %v1103_v59 = vmul.f32 0.5, %v3290_v57  ;;  %v1111_v61 = vmul.f32 1.442695, %v1104_v58 }
 0x384   : > { %2912 = vpow2.f32 %v1107_v56 }
 0x385   : > { %v1109_v60 = vmul.f32 1.442695, %v1103_v59 }
 0x387   : > { %2914 = vpow2.f32 %v1109_v60 }
 0x388   : > { %2916 = vpow2.f32 %v1111_v61 }
 0x390   : > { %v2911_v63 = vpop.eup %2910 }
 0x391   : > { %1137 = vrot.lane.b32.xlu0 %v2911_v63, %s3077_s18  ;;  %v2913_v0 = vpop.eup %2912 }
 0x394   : > { %v2915_v1 = vpop.eup %2914 }
 0x395   : > { %1139 = vrot.lane.b32.xlu0 %v2913_v0, %s3077_s18  ;;  %1141 = vrot.lane.b32.xlu1 %v2915_v1, %s3077_s18  ;;  %v2917_v2 = vpop.eup %2916 }
 0x399   : > { %1143 = vrot.lane.b32.xlu1 %v2917_v2, %s3077_s18  ;;  %s3082_s18 = smov 24  }
 0x403   : > { %v1138_v5 = vpop.permute.xlu0 %1137 }
 0x404   : > { %v1149_v6 = vmul.f32 %v1138_v5, %v593_v4 }
 0x406   : > { %1157 = vrot.lane.b32.xlu0 %v1149_v6, %s3698_s23 }
 0x407   : > { %v1140_v9 = vpop.permute.xlu0 %1139  ;;  %v1142_v10 = vpop.permute.xlu1 %1141 }
 0x408   : > { %v1150_v11 = vmul.f32 %v1140_v9, %v594_v7  ;;  %v1151_v12 = vmul.f32 %v1142_v10, %v595_v8  ;;  %v591_v8 = vld [vmem:[%s3344_s28 + $0x10] sm:$0xff] }
 0x40a   : > { %1159 = vrot.lane.b32.xlu1 %v1150_v11, %s3698_s23  ;;  %1161 = vrot.lane.b32.xlu0 %v1151_v12, %s3698_s23 }
 0x40b   : > { %v1144_v14 = vpop.permute.xlu1 %1143 }
 0x40c   : > { %v1152_v15 = vmul.f32 %v1144_v14, %v596_v13 }
 0x40e   : > { %1163 = vrot.lane.b32.xlu1 %v1152_v15, %s3698_s23 }
 0x412   : > { %1207 = vperm.xlu1 %2869, %v3281_v49  }
 0x416   : > { %2870 = vset.pattern.permute.xlu1 %v3078_v3 }
 0x478   : > { %v1158_v16 = vpop.permute.xlu0 %1157 }
 0x479   : > { %v3304_v17 = vadd.f32 %v1158_v16, %v3281_v49 }
 0x47b   : > { %1176 = vperm.xlu0 %2871, %v3304_v17  }
 0x47c   : > { %v1160_v18 = vpop.permute.xlu1 %1159  ;;  %v1162_v22 = vpop.permute.xlu0 %1161 }
 0x47d   : > { %v3308_v19 = vadd.f32 %v1160_v18, %v3276_v42  ;;  %v3318_v23 = vadd.f32 %v1162_v22, %v3290_v57 }
 0x47f   : > { %2872 = vset.pattern.permute.xlu0 %v3076_v62  ;;  %1181 = vperm.xlu1 %2870, %v3308_v19  }
 0x480   : > { %1212 = vperm.xlu0 %2872, %v3276_v42   ;;  %v1164_v20 = vpop.permute.xlu1 %1163 }
 0x481   : > { %v3313_v21 = vadd.f32 %v1164_v20, %v3286_v53 }
 0x483   : > { %2873 = vset.pattern.permute.xlu1 %v3076_v62 }
 0x484   : > { %2874 = vset.pattern.permute.xlu0 %v3078_v3  ;;  %1217 = vperm.xlu1 %2873, %v3290_v57  }
 0x485   : > { %1191 = vperm.xlu0 %2874, %v3313_v21  }
 0x488   : > { %2875 = vset.pattern.permute.xlu1 %v3078_v3 }
 0x489   : > { %1186 = vperm.xlu1 %2875, %v3318_v23   ;;  %1119 = vrot.lane.b32.xlu0 %v2913_v0, %s3080_s30 }
 0x48a   : > { %2877 = vset.pattern.permute.xlu0 %v3076_v62 }
 0x48d   : > { %2876 = vset.pattern.permute.xlu1 %v3076_v62  ;;  %1123 = vrot.lane.b32.xlu0 %v2917_v2, %s3080_s30  ;;  %v1208_v27 = vpop.permute.xlu1 %1207 }
 0x48e   : > { %1222 = vperm.xlu1 %2876, %v3286_v53   ;;  %v1231_v30 = vmul.f32 %v2559_v26, %v1208_v27 }
 0x491   : > { %2259 = vrot.lane.b32.xlu0 %v3276_v42, %s3081_s19 }
 0x492   : > { %1117 = vrot.lane.b32.xlu1 %v2911_v63, %s3080_s30 }
 0x495   : > { %2263 = vrot.lane.b32.xlu0 %v3286_v53, %s3081_s19 }
 0x496   : > { %1121 = vrot.lane.b32.xlu1 %v2915_v1, %s3080_s30  ;;  %v589_v1 = vld [vmem:[%s3344_s28] sm:$0xff]  ;;  %s3085_s30 = smov 21   ;;  %s561_s28 = sand.u32 1, %s3066_s22  }
 0x49a   : > { %2257 = vrot.lane.b32.xlu1 %v3281_v49, %s3081_s19 }
 0x49e   : > { %2261 = vrot.lane.b32.xlu1 %v3290_v57, %s3081_s19 }
 0x4f6   : > { %v1177_v29 = vpop.permute.xlu0 %1176 }
 0x4f7   : > { %v1200_v31 = vmul.f32 %v2558_v28, %v1177_v29 }
 0x4f9   : > { %v1235_v32 = vadd.f32 %v1231_v30, %v1200_v31 }
 0x4fa   : > { %v1182_v33 = vpop.permute.xlu1 %1181 }
 0x4fb   : > { %v1243_v34 = vmul.f32 0.70710677, %v1235_v32  ;;  %v1201_v35 = vmul.f32 %v2558_v28, %v1182_v33  ;;  %v1213_v36 = vpop.permute.xlu0 %1212  ;;  %v1239_v62 = vmul.f32 0.5, %v1235_v32 }
 0x4fc   : > { %v1232_v37 = vmul.f32 %v2559_v26, %v1213_v36 }
 0x4fd   : > { %2918 = verf.f32 %v1243_v34 }
 0x4fe   : > { %v1236_v38 = vadd.f32 %v1232_v37, %v1201_v35 }
 0x4ff   : > { %v1218_v39 = vpop.permute.xlu1 %1217 }
 0x500   : > { %v1244_v40 = vmul.f32 0.70710677, %v1236_v38  ;;  %v1192_v41 = vpop.permute.xlu0 %1191  ;;  %v1233_v46 = vmul.f32 %v2559_v26, %v1218_v39  ;;  %v1240_v9 = vmul.f32 0.5, %v1236_v38 }
 0x501   : > { %v1203_v60 = vmul.f32 %v2558_v28, %v1192_v41 }
 0x502   : > { %2920 = verf.f32 %v1244_v40 }
 0x504   : > { %v1120_v44 = vpop.permute.xlu0 %1119  ;;  %v1187_v45 = vpop.permute.xlu1 %1186 }
 0x505   : > { %v1130_v47 = vmul.f32 %v1120_v44, %v590_v43  ;;  %v1202_v48 = vmul.f32 %v2558_v28, %v1187_v45 }
 0x507   : > { %v1134_v51 = vadd.f32 %v1130_v47, %v3276_v42  ;;  %v1237_v52 = vadd.f32 %v1233_v46, %v1202_v48 }
 0x508   : > { %v1124_v54 = vpop.permute.xlu0 %1123 }
 0x509   : > { %v1245_v55 = vmul.f32 0.70710677, %v1237_v52  ;;  %v1132_v56 = vmul.f32 %v1124_v54, %v592_v50  ;;  %2281 = vrot.lane.b32.xlu0 %v1134_v51, %s3082_s18  ;;  %v1223_v58 = vpop.permute.xlu1 %1222  ;;  %v1241_v18 = vmul.f32 0.5, %v1237_v52 }
 0x50a   : > { %v2919_v59 = vpop.eup %2918  ;;  %v1234_v61 = vmul.f32 %v2559_v26, %v1223_v58 }
 0x50b   : > { %v1251_v63 = vadd.f32 1.0, %v2919_v59  ;;  %2922 = verf.f32 %v1245_v55  ;;  %v1136_v0 = vadd.f32 %v1132_v56, %v3286_v53 }
 0x50c   : > { %v1238_v2 = vadd.f32 %v1234_v61, %v1203_v60 }
 0x50d   : > { %v1255_v3 = vmul.f32 %v1251_v63, %v1239_v62  ;;  %2285 = vrot.lane.b32.xlu0 %v1136_v0, %s3082_s18  ;;  %v1118_v4 = vpop.permute.xlu1 %1117 }
 0x50e   : > { %v1246_v5 = vmul.f32 0.70710677, %v1238_v2  ;;  %v1129_v6 = vmul.f32 %v1118_v4, %v589_v1  ;;  %v1242_v25 = vmul.f32 0.5, %v1238_v2 }
 0x50f   : > { %v2921_v7 = vpop.eup %2920  ;;  %2731 = vmatprep.mubr.msk.f32.mxu0 %vm1260_vm8, %v1255_v3 }
 0x510   : > { %v1252_v10 = vadd.f32 1.0, %v2921_v7  ;;  %2924 = verf.f32 %v1246_v5  ;;  %v1133_v11 = vadd.f32 %v1129_v6, %v3281_v49 }
 0x511   : > { %2298 = vrot.lane.b32.xlu0 %v3276_v42, %s3083_s20  ;;  %v1122_v12 = vpop.permute.xlu1 %1121 }
 0x512   : > { %v1256_v13 = vmul.f32 %v1252_v10, %v1240_v9  ;;  %v1131_v14 = vmul.f32 %v1122_v12, %v591_v8  ;;  %2279 = vrot.lane.b32.xlu1 %v1133_v11, %s3082_s18  ;;  %2739 = vmatprep.mubr.msk.f32.mxu1 %vm1390_vm9, %v1133_v11 }
 0x513   : > { %2740 = vmatmul.mubr.msk.f32.vlgmr.msra.gmra.mxu1 %vm1390_vm9, %v1134_v51 }
 0x514   : > { %v1135_v15 = vadd.f32 %v1131_v14, %v3290_v57  ;;  %2732 = vmatmul.mubr.msk.f32.vlgmr.msra.gmra.mxu0 %vm1260_vm8, %v1256_v13 }
 0x515   : > { %2302 = vrot.lane.b32.xlu0 %v3286_v53, %s3083_s20 }
 0x516   : > { %2283 = vrot.lane.b32.xlu1 %v1135_v15, %s3082_s18  ;;  %2742 = vmatprep.mubr.msk.f32.mxu1 %vm1390_vm9, %v1135_v15  ;;  %s2532_s18 = sshll.u32 %s561_s28, 5 }
 0x517   : > { %2743 = vmatmul.mubr.msk.f32.gmra.mxu1 %vm1390_vm9, %v1136_v0 }
 0x518   : > { %v2923_v16 = vpop.eup %2922 }
 0x519   : > { %v1253_v20 = vadd.f32 1.0, %v2923_v16  ;;  %2320 = vrot.lane.b32.xlu0 %v3308_v19, %s3084_s26  ;;  %v1564_v19 = vld [vmem:[%s3689_s9] sm:$0x3f] }
 0x51a   : > { %2296 = vrot.lane.b32.xlu1 %v3281_v49, %s3083_s20  ;;  %2751 = vmatprep.subr.msk.mxu0 %vm1590_vm10, %v1564_v19 }
 0x51b   : > { %v1257_v22 = vmul.f32 %v1253_v20, %v1241_v18  ;;  %2752 = vmatpush3.msk.msra.mxu0 %vm1590_vm10, %v1564_v19 }
 0x51d   : > { %v2925_v24 = vpop.eup %2924  ;;  %2324 = vrot.lane.b32.xlu0 %v3313_v21, %s3084_s26  ;;  %2734 = vmatprep.mubr.msk.f32.mxu0 %vm1260_vm8, %v1257_v22 }
 0x51e   : > { %v1254_v26 = vadd.f32 1.0, %v2925_v24  ;;  %2300 = vrot.lane.b32.xlu1 %v3290_v57, %s3083_s20  ;;  %s3494_s20 = scalar_lea.vmem [#allocation2], %s2532_s18 }
 0x520   : > { %v1258_v27 = vmul.f32 %v1254_v26, %v1242_v25  ;;  %v1739_v25 = vld [vmem:[%s3690_s10] sm:$0xff] }
 0x521   : > { %2337 = vrot.lane.b32.xlu0 %v3276_v42, %s3085_s30  ;;  %2765 = vmatprep.subr.mxu1 %v1739_v25 }
 0x522   : > { %2735 = vmatmul.mubr.msk.f32.gmra.mxu0 %vm1260_vm8, %v1258_v27  ;;  %2318 = vrot.lane.b32.xlu1 %v3304_v17, %s3084_s26 }
 0x523   : > { %2766 = vmatpush3.msra.mxu1 %v1739_v25 }
 0x525   : > { %2341 = vrot.lane.b32.xlu0 %v3286_v53, %s3085_s30 }
 0x526   : > { %2335 = vrot.lane.b32.xlu1 %v3281_v49, %s3085_s30 }
 0x52a   : > { %2339 = vrot.lane.b32.xlu1 %v3290_v57, %s3085_s30  ;;  %s3087_s30 = smov 36  }
 0x52e   : > { %2322 = vrot.lane.b32.xlu1 %v3318_v23, %s3084_s26  ;;  %s3385_s26 = scalar_lea.vmem %s3695_s15, %s3232_s29  ;;  %s3086_s29 = smov 32  }
 0x52f   : > { %v597_v33 = vld [vmem:[%s3385_s26] sm:$0xff]  ;;  %v598_v34 = vld [vmem:[%s3385_s26 + $0x8] sm:$0xff]  ;;  %v600_v7 = vld [vmem:[%s3385_s26 + $0x18] sm:$0xff] }
 0x530   : > { %v1381_v40 = vmul.f32 1.6487212, %v597_v33  ;;  %v1382_v43 = vmul.f32 1.6487212, %v598_v34  ;;  %v599_v9 = vld [vmem:[%s3385_s26 + $0x10] sm:$0xff]  ;;  %s3088_s26 = smov 40  }
 0x531   : > { %v1384_v13 = vmul.f32 1.6487212, %v600_v7  ;;  %v1383_v18 = vmul.f32 1.6487212, %v599_v9 }
 0x5d3   : > { %v2741_v42 = vpop.f32.mrf.mxu1 }
 0x5d4   : > { %v1533_v21 = vmul.f32 0.70710677, %v2741_v42  ;;  %v2733_v28 = vpop.f32.mrf.mxu0  ;;  %v1525_v50 = vmul.f32 0.5, %v2741_v42 }
 0x5d5   : > { %v1366_v17 = vmul.f32 0.70710677, %v2733_v28  ;;  %v1485_v29 = vpop.f32.mrf.mxu1  ;;  %v1362_v39 = vmul.f32 0.5, %v2733_v28 }
 0x5d6   : > { %2926 = verf.f32 %v1533_v21  ;;  %v1532_v53 = vmul.f32 0.70710677, %v1485_v29  ;;  %v1342_v49 = vpop.f32.mrf.mxu0  ;;  %v1524_v51 = vmul.f32 0.5, %v1485_v29 }
 0x5d7   : > { %2928 = verf.f32 %v1366_v17  ;;  %v1365_v57 = vmul.f32 0.70710677, %v1342_v49  ;;  %v2744_v30 = vpop.f32.mrf.mxu1  ;;  %v1361_v56 = vmul.f32 0.5, %v1342_v49 }
 0x5d8   : > { %2930 = verf.f32 %v1532_v53  ;;  %v1535_v23 = vmul.f32 0.70710677, %v2744_v30  ;;  %v1527_v3 = vmul.f32 0.5, %v2744_v30 }
 0x5d9   : > { %2932 = verf.f32 %v1365_v57  ;;  %v1495_v31 = vpop.f32.mrf.mxu1 }
 0x5da   : > { %2934 = verf.f32 %v1535_v23  ;;  %v1534_v32 = vmul.f32 0.70710677, %v1495_v31  ;;  %v1526_v0 = vmul.f32 0.5, %v1495_v31 }
 0x5dc   : > { %2936 = verf.f32 %v1534_v32 }
 0x5e2   : > { %v2736_v35 = vpop.f32.mrf.mxu0 }
 0x5e3   : > { %v2927_v36 = vpop.eup %2926  ;;  %v1368_v37 = vmul.f32 0.70710677, %v2736_v35  ;;  %v1364_v10 = vmul.f32 0.5, %v2736_v35 }
 0x5e4   : > { %v2929_v38 = vpop.eup %2928  ;;  %v1352_v41 = vpop.f32.mrf.mxu0  ;;  %v1549_v45 = vadd.f32 1.0, %v2927_v36 }
 0x5e5   : > { %v2931_v44 = vpop.eup %2930  ;;  %v1374_v46 = vadd.f32 1.0, %v2929_v38  ;;  %2938 = verf.f32 %v1368_v37  ;;  %v1367_v47 = vmul.f32 0.70710677, %v1352_v41  ;;  %v1363_v15 = vmul.f32 0.5, %v1352_v41 }
 0x5e6   : > { %v2933_v48 = vpop.eup %2932  ;;  %v1548_v52 = vadd.f32 1.0, %v2931_v44  ;;  %v1557_v61 = vmul.f32 %v1549_v45, %v1525_v50 }
 0x5e7   : > { %v2935_v54 = vpop.eup %2934  ;;  %v1378_v55 = vmul.f32 %v1374_v46, %v1362_v39  ;;  %v1373_v58 = vadd.f32 1.0, %v2933_v48  ;;  %2940 = verf.f32 %v1367_v47 }
 0x5e8   : > { %v1556_v59 = vmul.f32 %v1548_v52, %v1524_v51  ;;  %v1551_v63 = vadd.f32 1.0, %v2935_v54 }
 0x5e9   : > { %v2937_v60 = vpop.eup %2936  ;;  %v1377_v62 = vmul.f32 %v1373_v58, %v1361_v56  ;;  %2358 = vrot.lane.b32.xlu0 %v1378_v55, %s3086_s29  ;;  %v1386_v4 = vadd.f32 %v1382_v43, %v1378_v55 }
 0x5ea   : > { %v1550_v1 = vadd.f32 1.0, %v2937_v60  ;;  %2753 = vmatprep.mubr.msk.f32.mxu0 %vm1565_vm11, %v1556_v59  ;;  %v1559_v6 = vmul.f32 %v1551_v63, %v1527_v3 }
 0x5eb   : > { %v1385_v2 = vadd.f32 %v1381_v40, %v1377_v62  ;;  %2754 = vmatmul.mubr.msk.f32.vlgmr.msra.gmra.mxu0 %vm1565_vm11, %v1557_v61  ;;  %2356 = vrot.lane.b32.xlu1 %v1377_v62, %s3086_s29 }
 0x5ec   : > { %v1558_v5 = vmul.f32 %v1550_v1, %v1526_v0 }
 0x5ed   : > { %2375 = vrot.lane.b32.xlu0 %v1386_v4, %s3087_s30  ;;  %2745 = vmatprep.mubr.msk.f32.mxu1 %vm1390_vm9, %v1385_v2 }
 0x5ee   : > { %2746 = vmatmul.mubr.msk.f32.gmra.mxu1 %vm1390_vm9, %v1386_v4  ;;  %2756 = vmatprep.mubr.msk.f32.mxu0 %vm1565_vm11, %v1558_v5 }
 0x5ef   : > { %2373 = vrot.lane.b32.xlu1 %v1385_v2, %s3087_s30  ;;  %2757 = vmatmul.mubr.msk.f32.gmra.mxu0 %vm1565_vm11, %v1559_v6  ;;  %v1909_v6 = vld [vmem:[%s3691_s11] sm:$0xff] }
 0x5f0   : > { %2779 = vmatprep.subr.mxu0 %v1909_v6 }
 0x5f1   : > { %2780 = vmatpush3.msra.mxu0 %v1909_v6 }
 0x5f2   : > { %v2939_v8 = vpop.eup %2938 }
 0x5f3   : > { %v1376_v11 = vadd.f32 1.0, %v2939_v8 }
 0x5f4   : > { %v2941_v12 = vpop.eup %2940 }
 0x5f5   : > { %v1380_v14 = vmul.f32 %v1376_v11, %v1364_v10  ;;  %v1375_v16 = vadd.f32 1.0, %v2941_v12 }
 0x5f7   : > { %v1379_v20 = vmul.f32 %v1375_v16, %v1363_v15  ;;  %2362 = vrot.lane.b32.xlu0 %v1380_v14, %s3086_s29  ;;  %v1388_v24 = vadd.f32 %v1384_v13, %v1380_v14 }
 0x5f9   : > { %v1387_v22 = vadd.f32 %v1383_v18, %v1379_v20  ;;  %2360 = vrot.lane.b32.xlu1 %v1379_v20, %s3086_s29  ;;  %s2613_s29 = sshll.u32 %s3198_s25, 9  ;;  %s3639_s25 = scalar_lea.sflag [#allocation3], %s561_s28 }
 0x5fb   : > { %2379 = vrot.lane.b32.xlu0 %v1388_v24, %s3087_s30  ;;  %2748 = vmatprep.mubr.msk.f32.mxu1 %vm1390_vm9, %v1387_v22 }
 0x5fc   : > { %2749 = vmatmul.mubr.msk.f32.gmra.mxu1 %vm1390_vm9, %v1388_v24 }
 0x5fd   : > { %2377 = vrot.lane.b32.xlu1 %v1387_v22, %s3087_s30  ;;  %s2430_s30 = sshll.u32 %s3494_s20, 4  ;;  %s3631_s30 = int_to_ptr.vmem [resolvable:$true] %s2430_s30 }
 0x5fe   : > { %s3014_s23 = scalar_lea.vmem %s3631_s30, 512 }
 0x5ff   : > { %p3015_p11 = scmp.ne.s32.totalorder %s3631_s30, %s3014_s23 }
 0x601   : > { %p3016_p12 = pnand %p3015_p11, %p3215_p5 }
 0x603   : > { %p3017_p13 = pneg %p3016_p12 }
 0x6ab   : > { %v2755_v26 = vpop.f32.mrf.mxu0 }
 0x6ac   : > { %v1708_v27 = vmul.f32 0.70710677, %v2755_v26  ;;  %v1700_v40 = vmul.f32 0.5, %v2755_v26 }
 0x6ad   : > { %v1660_v19 = vpop.f32.mrf.mxu0 }
 0x6ae   : > { %2942 = verf.f32 %v1708_v27  ;;  %v1707_v42 = vmul.f32 0.70710677, %v1660_v19  ;;  %v2747_v21 = vpop.f32.mrf.mxu1  ;;  %v1699_v36 = vmul.f32 0.5, %v1660_v19 }
 0x6af   : > { %v1537_v28 = vmul.f32 0.70710677, %v2747_v21  ;;  %v2758_v17 = vpop.f32.mrf.mxu0  ;;  %v1529_v52 = vmul.f32 0.5, %v2747_v21 }
 0x6b0   : > { %2944 = verf.f32 %v1707_v42  ;;  %v1710_v29 = vmul.f32 0.70710677, %v2758_v17  ;;  %v1505_v53 = vpop.f32.mrf.mxu1  ;;  %v1702_v56 = vmul.f32 0.5, %v2758_v17 }
 0x6b1   : > { %2946 = verf.f32 %v1537_v28  ;;  %v1536_v49 = vmul.f32 0.70710677, %v1505_v53  ;;  %v1670_v57 = vpop.f32.mrf.mxu0  ;;  %v1528_v46 = vmul.f32 0.5, %v1505_v53 }
 0x6b2   : > { %2948 = verf.f32 %v1710_v29  ;;  %v1709_v30 = vmul.f32 0.70710677, %v1670_v57  ;;  %v1701_v54 = vmul.f32 0.5, %v1670_v57 }
 0x6b3   : > { %2950 = verf.f32 %v1536_v49 }
 0x6b4   : > { %2952 = verf.f32 %v1709_v30 }
 0x6bb   : > { %v2943_v23 = vpop.eup %2942 }
 0x6bc   : > { %v2750_v31 = vpop.f32.mrf.mxu1  ;;  %v1724_v33 = vadd.f32 1.0, %v2943_v23 }
 0x6bd   : > { %v2945_v32 = vpop.eup %2944  ;;  %v1539_v34 = vmul.f32 0.70710677, %v2750_v31  ;;  %v1531_v3 = vmul.f32 0.5, %v2750_v31 }
 0x6be   : > { %v2947_v35 = vpop.eup %2946  ;;  %v1723_v37 = vadd.f32 1.0, %v2945_v32  ;;  %v1515_v38 = vpop.f32.mrf.mxu1  ;;  %v1732_v48 = vmul.f32 %v1724_v33, %v1700_v40 }
 0x6bf   : > { %v2949_v39 = vpop.eup %2948  ;;  %2954 = verf.f32 %v1539_v34  ;;  %v1538_v41 = vmul.f32 0.70710677, %v1515_v38  ;;  %v1553_v45 = vadd.f32 1.0, %v2947_v35  ;;  %v1530_v1 = vmul.f32 0.5, %v1515_v38 }
 0x6c0   : > { %v2951_v43 = vpop.eup %2950  ;;  %v1731_v44 = vmul.f32 %v1723_v37, %v1699_v36  ;;  %v1726_v50 = vadd.f32 1.0, %v2949_v39 }
 0x6c1   : > { %v2953_v47 = vpop.eup %2952  ;;  %v1552_v51 = vadd.f32 1.0, %v2951_v43  ;;  %2956 = verf.f32 %v1538_v41  ;;  %v1561_v59 = vmul.f32 %v1553_v45, %v1529_v52 }
 0x6c2   : > { %v1725_v55 = vadd.f32 1.0, %v2953_v47  ;;  %2767 = vmatprep.mubr.msk.f32.mxu1 %vm850_vm3, %v1731_v44  ;;  %v1734_v61 = vmul.f32 %v1726_v50, %v1702_v56 }
 0x6c3   : > { %v1560_v58 = vmul.f32 %v1552_v51, %v1528_v46  ;;  %2768 = vmatmul.mubr.msk.f32.vlgmr.msra.gmra.mxu1 %vm850_vm3, %v1732_v48 }
 0x6c4   : > { %v1733_v60 = vmul.f32 %v1725_v55, %v1701_v54  ;;  %v2080_v54 = vld [vmem:[%s3692_s12 + $0x8] sm:$0x7]  ;;  %v2079_v55 = vld [vmem:[%s3692_s12] sm:$0xff] }
 0x6c5   : > { %2759 = vmatprep.mubr.msk.f32.mxu0 %vm1565_vm11, %v1560_v58  ;;  %2793 = vmatprep.subr.msk.mxu1 %vm740_vm1, %v2080_v54 }
 0x6c6   : > { %2760 = vmatmul.mubr.msk.f32.gmra.mxu0 %vm1565_vm11, %v1561_v59  ;;  %2770 = vmatprep.mubr.msk.f32.mxu1 %vm850_vm3, %v1733_v60 }
 0x6c7   : > { %2771 = vmatmul.mubr.msk.f32.gmra.mxu1 %vm850_vm3, %v1734_v61 }
 0x6c8   : > { %2794 = vmatpush3.msk.msra.mxu1 %vm740_vm1, %v2080_v54  ;;  %vm2313_vm1 = vcmask 244968  }
 0x6c9   : > { %2795 = vmatprep.subr.mxu1 %v2079_v55 }
 0x6ca   : > { %2796 = vmatpush3.msra.mxu1 %v2079_v55 }
 0x6cc   : > { %v2955_v62 = vpop.eup %2954 }
 0x6cd   : > { %v1555_v0 = vadd.f32 1.0, %v2955_v62 }
 0x6ce   : > { %v2957_v63 = vpop.eup %2956 }
 0x6cf   : > { %v1554_v2 = vadd.f32 1.0, %v2957_v63  ;;  %v1563_v5 = vmul.f32 %v1555_v0, %v1531_v3 }
 0x6d1   : > { %v1562_v4 = vmul.f32 %v1554_v2, %v1530_v1 }
 0x6d3   : > { %2762 = vmatprep.mubr.msk.f32.mxu0 %vm1565_vm11, %v1562_v4 }
 0x6d4   : > { %2763 = vmatmul.mubr.msk.f32.gmra.mxu0 %vm1565_vm11, %v1563_v5 }
 0x783   : > { %v2769_v7 = vpop.f32.mrf.mxu1 }
 0x784   : > { %v1878_v8 = vmul.f32 0.70710677, %v2769_v7  ;;  %v1870_v29 = vmul.f32 0.5, %v2769_v7 }
 0x785   : > { %v1830_v9 = vpop.f32.mrf.mxu1 }
 0x786   : > { %2958 = verf.f32 %v1878_v8  ;;  %v1877_v10 = vmul.f32 0.70710677, %v1830_v9  ;;  %v2761_v11 = vpop.f32.mrf.mxu0  ;;  %v1869_v42 = vmul.f32 0.5, %v1830_v9 }
 0x787   : > { %v1712_v12 = vmul.f32 0.70710677, %v2761_v11  ;;  %v2772_v13 = vpop.f32.mrf.mxu1  ;;  %v1704_v35 = vmul.f32 0.5, %v2761_v11 }
 0x788   : > { %2960 = verf.f32 %v1877_v10  ;;  %v1880_v14 = vmul.f32 0.70710677, %v2772_v13  ;;  %v1680_v15 = vpop.f32.mrf.mxu0  ;;  %v1872_v38 = vmul.f32 0.5, %v2772_v13 }
 0x789   : > { %2962 = verf.f32 %v1712_v12  ;;  %v1711_v16 = vmul.f32 0.70710677, %v1680_v15  ;;  %v1840_v18 = vpop.f32.mrf.mxu1  ;;  %v1703_v23 = vmul.f32 0.5, %v1680_v15 }
 0x78a   : > { %2964 = verf.f32 %v1880_v14  ;;  %v1879_v20 = vmul.f32 0.70710677, %v1840_v18  ;;  %v1871_v36 = vmul.f32 0.5, %v1840_v18 }
 0x78b   : > { %2966 = verf.f32 %v1711_v16 }
 0x78c   : > { %2968 = verf.f32 %v1879_v20 }
 0x793   : > { %v2959_v22 = vpop.eup %2958 }
 0x794   : > { %v2764_v24 = vpop.f32.mrf.mxu0  ;;  %v1894_v26 = vadd.f32 1.0, %v2959_v22 }
 0x795   : > { %v2961_v25 = vpop.eup %2960  ;;  %v1714_v27 = vmul.f32 0.70710677, %v2764_v24  ;;  %v1706_v50 = vmul.f32 0.5, %v2764_v24 }
 0x796   : > { %v2963_v19 = vpop.eup %2962  ;;  %v1893_v21 = vadd.f32 1.0, %v2961_v25  ;;  %v1690_v28 = vpop.f32.mrf.mxu0  ;;  %v1902_v32 = vmul.f32 %v1894_v26, %v1870_v29 }
 0x797   : > { %v2965_v17 = vpop.eup %2964  ;;  %2970 = verf.f32 %v1714_v27  ;;  %v1713_v53 = vmul.f32 0.70710677, %v1690_v28  ;;  %v1728_v30 = vadd.f32 1.0, %v2963_v19  ;;  %v1705_v47 = vmul.f32 0.5, %v1690_v28 }
 0x798   : > { %v2967_v49 = vpop.eup %2966  ;;  %v1901_v57 = vmul.f32 %v1893_v21, %v1869_v42  ;;  %v1896_v33 = vadd.f32 1.0, %v2965_v17 }
 0x799   : > { %v2969_v31 = vpop.eup %2968  ;;  %v1727_v34 = vadd.f32 1.0, %v2967_v49  ;;  %2972 = verf.f32 %v1713_v53  ;;  %v1736_v40 = vmul.f32 %v1728_v30, %v1704_v35 }
 0x79a   : > { %v1895_v37 = vadd.f32 1.0, %v2969_v31  ;;  %2781 = vmatprep.mubr.msk.f32.mxu0 %vm850_vm3, %v1901_v57  ;;  %v1904_v43 = vmul.f32 %v1896_v33, %v1872_v38  ;;  %v3443_v38 = vpop.permute.xlu1 %2257 }
 0x79b   : > { %v1735_v39 = vmul.f32 %v1727_v34, %v1703_v23  ;;  %2782 = vmatmul.mubr.msk.f32.vlgmr.msra.gmra.mxu0 %vm850_vm3, %v1902_v32 }
 0x79c   : > { %v1903_v41 = vmul.f32 %v1895_v37, %v1871_v36  ;;  %v3441_v37 = vpop.permute.xlu0 %2259 }
 0x79d   : > { %2773 = vmatprep.mubr.msk.f32.mxu1 %vm850_vm3, %v1735_v39 }
 0x79e   : > { %2774 = vmatmul.mubr.msk.f32.gmra.mxu1 %vm850_vm3, %v1736_v40  ;;  %2784 = vmatprep.mubr.msk.f32.mxu0 %vm850_vm3, %v1903_v41  ;;  %v3447_v40 = vpop.permute.xlu1 %2261 }
 0x79f   : > { %2785 = vmatmul.mubr.msk.f32.gmra.mxu0 %vm850_vm3, %v1904_v43 }
 0x7a0   : > { %v3445_v39 = vpop.permute.xlu0 %2263 }
 0x7a2   : > { %v3451_v43 = vpop.permute.xlu1 %2279 }
 0x7a4   : > { %v2971_v44 = vpop.eup %2970  ;;  %v3449_v41 = vpop.permute.xlu0 %2281 }
 0x7a5   : > { %v1730_v46 = vadd.f32 1.0, %v2971_v44 }
 0x7a6   : > { %v2973_v45 = vpop.eup %2972 }
 0x7a7   : > { %v1729_v48 = vadd.f32 1.0, %v2973_v45  ;;  %v1738_v52 = vmul.f32 %v1730_v46, %v1706_v50  ;;  %v3455_v45 = vpop.permute.xlu1 %2283 }
 0x7a8   : > { %v3453_v44 = vpop.permute.xlu0 %2285 }
 0x7a9   : > { %v1737_v51 = vmul.f32 %v1729_v48, %v1705_v47 }
 0x7ab   : > { %2776 = vmatprep.mubr.msk.f32.mxu1 %vm850_vm3, %v1737_v51  ;;  %v3459_v47 = vpop.permute.xlu1 %2296 }
 0x7ac   : > { %2777 = vmatmul.mubr.msk.f32.gmra.mxu1 %vm850_vm3, %v1738_v52  ;;  %v3457_v46 = vpop.permute.xlu0 %2298 }
 0x7af   : > { %v3463_v50 = vpop.permute.xlu1 %2300 }
 0x7b0   : > { %v3461_v48 = vpop.permute.xlu0 %2302 }
 0x7b3   : > { %v3467_v52 = vpop.permute.xlu1 %2318 }
 0x7b4   : > { %v3465_v51 = vpop.permute.xlu0 %2320 }
 0x7b8   : > { %v3469_v55 = vpop.permute.xlu0 %2324 }
 0x85b   : > { %v2783_v56 = vpop.f32.mrf.mxu0 }
 0x85c   : > { %v2048_v58 = vmul.f32 0.70710677, %v2783_v56  ;;  %v2040_v15 = vmul.f32 0.5, %v2783_v56 }
 0x85d   : > { %v2000_v59 = vpop.f32.mrf.mxu0 }
 0x85e   : > { %2974 = verf.f32 %v2048_v58  ;;  %v2047_v60 = vmul.f32 0.70710677, %v2000_v59  ;;  %v2775_v61 = vpop.f32.mrf.mxu1  ;;  %v2039_v11 = vmul.f32 0.5, %v2000_v59  ;;  %v3471_v59 = vpop.permute.xlu1 %2335 }
 0x85f   : > { %v1882_v62 = vmul.f32 0.70710677, %v2775_v61  ;;  %v2786_v63 = vpop.f32.mrf.mxu0  ;;  %v1874_v42 = vmul.f32 0.5, %v2775_v61 }
 0x860   : > { %2976 = verf.f32 %v2047_v60  ;;  %v2050_v0 = vmul.f32 0.70710677, %v2786_v63  ;;  %v1850_v1 = vpop.f32.mrf.mxu1  ;;  %v2042_v17 = vmul.f32 0.5, %v2786_v63 }
 0x861   : > { %2978 = verf.f32 %v1882_v62  ;;  %v1881_v2 = vmul.f32 0.70710677, %v1850_v1  ;;  %v2010_v3 = vpop.f32.mrf.mxu0  ;;  %v1873_v24 = vmul.f32 0.5, %v1850_v1 }
 0x862   : > { %2980 = verf.f32 %v2050_v0  ;;  %v2049_v4 = vmul.f32 0.70710677, %v2010_v3  ;;  %v2041_v21 = vmul.f32 0.5, %v2010_v3 }
 0x863   : > { %2982 = verf.f32 %v1881_v2 }
 0x864   : > { %2984 = verf.f32 %v2049_v4  ;;  %v3473_v4 = vpop.permute.xlu0 %2337 }
 0x86b   : > { %v2975_v5 = vpop.eup %2974 }
 0x86c   : > { %v2778_v6 = vpop.f32.mrf.mxu1  ;;  %v2064_v8 = vadd.f32 1.0, %v2975_v5 }
 0x86d   : > { %v2977_v7 = vpop.eup %2976  ;;  %v1884_v9 = vmul.f32 0.70710677, %v2778_v6  ;;  %v1876_v34 = vmul.f32 0.5, %v2778_v6  ;;  %v3475_v6 = vpop.permute.xlu1 %2339 }
 0x86e   : > { %v2979_v10 = vpop.eup %2978  ;;  %v2063_v12 = vadd.f32 1.0, %v2977_v7  ;;  %v1860_v13 = vpop.f32.mrf.mxu1  ;;  %v2072_v26 = vmul.f32 %v2064_v8, %v2040_v15 }
 0x86f   : > { %v2981_v14 = vpop.eup %2980  ;;  %2986 = verf.f32 %v1884_v9  ;;  %v1883_v16 = vmul.f32 0.70710677, %v1860_v13  ;;  %v1898_v22 = vadd.f32 1.0, %v2979_v10  ;;  %v1875_v32 = vmul.f32 0.5, %v1860_v13  ;;  %v3478_v7 = vpop.permute.xlu0 %2341 }
 0x870   : > { %v2983_v18 = vpop.eup %2982  ;;  %v2071_v20 = vmul.f32 %v2063_v12, %v2039_v11  ;;  %v2066_v27 = vadd.f32 1.0, %v2981_v14 }
 0x871   : > { %v2985_v25 = vpop.eup %2984  ;;  %v1897_v19 = vadd.f32 1.0, %v2983_v18  ;;  %2988 = verf.f32 %v1883_v16  ;;  %v1906_v53 = vmul.f32 %v1898_v22, %v1874_v42  ;;  %v3480_v8 = vpop.permute.xlu1 %2322 }
 0x872   : > { %v2065_v28 = vadd.f32 1.0, %v2985_v25  ;;  %2797 = vmatprep.mubr.msk.f32.mxu1 %vm727_vm2, %v2071_v20  ;;  %v2074_v57 = vmul.f32 %v2066_v27, %v2042_v17 }
 0x873   : > { %v1905_v29 = vmul.f32 %v1897_v19, %v1873_v24  ;;  %2798 = vmatmul.mubr.msk.f32.vlgmr.msra.gmra.mxu1 %vm727_vm2, %v2072_v26  ;;  %v3484_v10 = vpop.permute.xlu0 %2358 }
 0x874   : > { %v2073_v49 = vmul.f32 %v2065_v28, %v2041_v21 }
 0x875   : > { %2787 = vmatprep.mubr.msk.f32.mxu0 %vm850_vm3, %v1905_v29  ;;  %v3489_v18 = vpop.permute.xlu1 %2356 }
 0x876   : > { %2788 = vmatmul.mubr.msk.f32.gmra.mxu0 %vm850_vm3, %v1906_v53  ;;  %2800 = vmatprep.mubr.msk.f32.mxu1 %vm727_vm2, %v2073_v49 }
 0x877   : > { %2801 = vmatmul.mubr.msk.f32.gmra.mxu1 %vm727_vm2, %v2074_v57  ;;  %v2376_v57 = vpop.permute.xlu0 %2375 }
 0x87c   : > { %v2987_v30 = vpop.eup %2986 }
 0x87d   : > { %v1900_v31 = vadd.f32 1.0, %v2987_v30 }
 0x87e   : > { %v2989_v23 = vpop.eup %2988 }
 0x87f   : > { %v1899_v33 = vadd.f32 1.0, %v2989_v23  ;;  %v1908_v36 = vmul.f32 %v1900_v31, %v1876_v34  ;;  %v2374_v34 = vpop.permute.xlu1 %2373 }
 0x881   : > { %v1907_v35 = vmul.f32 %v1899_v33, %v1875_v32 }
 0x883   : > { %2790 = vmatprep.mubr.msk.f32.mxu0 %vm850_vm3, %v1907_v35 }
 0x884   : > { %2791 = vmatmul.mubr.msk.f32.gmra.mxu0 %vm850_vm3, %v1908_v36  ;;  %vm2330_vm3 = vcmask 253168  }
 0x933   : > { %v2799_v54 = vpop.f32.mrf.mxu1 }
 0x934   : > { %v2222_v56 = vmul.f32 0.70710677, %v2799_v54  ;;  %v2214_v11 = vmul.f32 0.5, %v2799_v54 }
 0x935   : > { %v2174_v58 = vpop.f32.mrf.mxu1 }
 0x936   : > { %2990 = verf.f32 %v2222_v56  ;;  %v2221_v60 = vmul.f32 0.70710677, %v2174_v58  ;;  %v2789_v61 = vpop.f32.mrf.mxu0  ;;  %v2213_v22 = vmul.f32 0.5, %v2174_v58 }
 0x937   : > { %v2052_v62 = vmul.f32 0.70710677, %v2789_v61  ;;  %v2802_v63 = vpop.f32.mrf.mxu1  ;;  %v2044_v30 = vmul.f32 0.5, %v2789_v61 }
 0x938   : > { %2992 = verf.f32 %v2221_v60  ;;  %v2224_v0 = vmul.f32 0.70710677, %v2802_v63  ;;  %v2020_v1 = vpop.f32.mrf.mxu0  ;;  %v2216_v28 = vmul.f32 0.5, %v2802_v63 }
 0x939   : > { %2994 = verf.f32 %v2052_v62  ;;  %v2051_v2 = vmul.f32 0.70710677, %v2020_v1  ;;  %v2184_v3 = vpop.f32.mrf.mxu1  ;;  %v2043_v53 = vmul.f32 0.5, %v2020_v1 }
 0x93a   : > { %2996 = verf.f32 %v2224_v0  ;;  %v2223_v5 = vmul.f32 0.70710677, %v2184_v3  ;;  %v2215_v31 = vmul.f32 0.5, %v2184_v3 }
 0x93b   : > { %2998 = verf.f32 %v2051_v2 }
 0x93c   : > { %3000 = verf.f32 %v2223_v5 }
 0x943   : > { %v2991_v9 = vpop.eup %2990 }
 0x944   : > { %v2238_v12 = vadd.f32 1.0, %v2991_v9  ;;  %v3486_v13 = vpop.f32.mrf.mxu0 }
 0x945   : > { %v2993_v14 = vpop.eup %2992  ;;  %v2054_v15 = vmul.f32 0.70710677, %v3486_v13 }
 0x946   : > { %v2995_v16 = vpop.eup %2994  ;;  %v2246_v20 = vmul.f32 %v2238_v12, %v2214_v11  ;;  %v2237_v24 = vadd.f32 1.0, %v2993_v14  ;;  %v3491_v25 = vpop.f32.mrf.mxu0  ;;  %v3089_v14 = vmov 0.0  }
 0x947   : > { %v2997_v26 = vpop.eup %2996  ;;  %3002 = verf.f32 %v2054_v15  ;;  %v2053_v27 = vmul.f32 0.70710677, %v3491_v25  ;;  %v2068_v21 = vadd.f32 1.0, %v2995_v16 }
 0x948   : > { %v2999_v19 = vpop.eup %2998  ;;  %2254 = vst.msk [vmem:[%s3494_s20 + $0x8] sm:$0xff] %vm607_vm0, %v2246_v20  ;;  %v2245_v42 = vmul.f32 %v2237_v24, %v2213_v22  ;;  %v2240_v17 = vadd.f32 1.0, %v2997_v26 }
 0x949   : > { %v3001_v29 = vpop.eup %3000  ;;  %2271 = vst.msk [vmem:[%s3494_s20 + $0x8] sm:$0xff] %vm2269_vm12, %v3441_v37  ;;  %v2067_v49 = vadd.f32 1.0, %v2999_v19  ;;  %3004 = verf.f32 %v2053_v27  ;;  %v2076_v35 = vmul.f32 %v2068_v21, %v2044_v30 }
 0x94a   : > { %2276 = vst.msk [vmem:[%s3494_s20 + $0x8] sm:$0xff] %vm2274_vm13, %v3441_v37  ;;  %v2248_v23 = vmul.f32 %v2240_v17, %v2216_v28  ;;  %v2239_v32 = vadd.f32 1.0, %v3001_v29  ;;  %v2363_v37 = vpop.permute.xlu0 %2362 }
 0x94b   : > { %2253 = vst.msk [vmem:[%s3494_s20] sm:$0xff] %vm607_vm0, %v2245_v42  ;;  %v2075_v33 = vmul.f32 %v2067_v49, %v2043_v53 }
 0x94c   : > { %2293 = vst.msk [vmem:[%s3494_s20 + $0x8] sm:$0xff] %vm2291_vm14, %v3449_v41  ;;  %v2247_v36 = vmul.f32 %v2239_v32, %v2215_v31 }
 0x94d   : > { %2270 = vst.msk [vmem:[%s3494_s20] sm:$0xff] %vm2269_vm12, %v3443_v38  ;;  %2803 = vmatprep.mubr.msk.f32.mxu1 %vm727_vm2, %v2075_v33 }
 0x94e   : > { %2310 = vst.msk [vmem:[%s3494_s20 + $0x8] sm:$0xff] %vm2308_vm15, %v3457_v46  ;;  %2804 = vmatmul.mubr.msk.f32.gmra.mxu1 %vm727_vm2, %v2076_v35 }
 0x94f   : > { %2275 = vst.msk [vmem:[%s3494_s20] sm:$0xff] %vm2274_vm13, %v3443_v38  ;;  %v2361_v38 = vpop.permute.xlu1 %2360 }
 0x950   : > { %2256 = vst.msk [vmem:[%s3494_s20 + $0x18] sm:$0xff] %vm607_vm0, %v2248_v23  ;;  %2255 = vst.msk [vmem:[%s3494_s20 + $0x10] sm:$0xff] %vm607_vm0, %v2247_v36  ;;  %vm2406_vm0 = vcmask 458048  }
 0x951   : > { %2292 = vst.msk [vmem:[%s3494_s20] sm:$0xff] %vm2291_vm14, %v3451_v43 }
 0x952   : > { %2273 = vst.msk [vmem:[%s3494_s20 + $0x18] sm:$0xff] %vm2269_vm12, %v3445_v39  ;;  %2272 = vst.msk [vmem:[%s3494_s20 + $0x10] sm:$0xff] %vm2269_vm12, %v3447_v40 }
 0x953   : > { %2315 = vst.msk [vmem:[%s3494_s20 + $0x8] sm:$0xff] %vm2313_vm1, %v3457_v46  ;;  %v2378_v43 = vpop.permute.xlu1 %2377 }
 0x954   : > { %2309 = vst.msk [vmem:[%s3494_s20] sm:$0xff] %vm2308_vm15, %v3459_v47 }
 0x955   : > { %2278 = vst.msk [vmem:[%s3494_s20 + $0x18] sm:$0xff] %vm2274_vm13, %v3445_v39  ;;  %2277 = vst.msk [vmem:[%s3494_s20 + $0x10] sm:$0xff] %vm2274_vm13, %v3447_v40  ;;  %v3003_v39 = vpop.eup %3002  ;;  %v2380_v40 = vpop.permute.xlu0 %2379 }
 0x956   : > { %2332 = vst.msk [vmem:[%s3494_s20 + $0x8] sm:$0xff] %vm2330_vm3, %v3465_v51  ;;  %v3005_v41 = vpop.eup %3004 }
 0x957   : > { %2295 = vst.msk [vmem:[%s3494_s20 + $0x18] sm:$0xff] %vm2291_vm14, %v3453_v44  ;;  %2294 = vst.msk [vmem:[%s3494_s20 + $0x10] sm:$0xff] %vm2291_vm14, %v3455_v45  ;;  %v2070_v44 = vadd.f32 1.0, %v3003_v39  ;;  %v2045_v45 = vmul.f32 0.5, %v3491_v25  ;;  %v2069_v46 = vadd.f32 1.0, %v3005_v41 }
 0x958   : > { %2349 = vst.msk [vmem:[%s3494_s20 + $0x8] sm:$0xff] %vm2347_vm4, %v3473_v4 }
 0x959   : > { %2314 = vst.msk [vmem:[%s3494_s20] sm:$0xff] %vm2313_vm1, %v3459_v47  ;;  %v2046_v47 = vmul.f32 0.5, %v3486_v13 }
 0x95a   : > { %2312 = vst.msk [vmem:[%s3494_s20 + $0x18] sm:$0xff] %vm2308_vm15, %v3461_v48  ;;  %2311 = vst.msk [vmem:[%s3494_s20 + $0x10] sm:$0xff] %vm2308_vm15, %v3463_v50 }
 0x95b   : > { %2370 = vst.msk [vmem:[%s3494_s20 + $0x8] sm:$0xff] %vm2368_vm5, %v3484_v10 }
 0x95c   : > { %2331 = vst.msk [vmem:[%s3494_s20] sm:$0xff] %vm2330_vm3, %v3467_v52 }
 0x95d   : > { %2387 = vst.msk [vmem:[%s3494_s20 + $0x8] sm:$0xff] %vm2385_vm6, %v2376_v57 }
 0x95e   : > { %2317 = vst.msk [vmem:[%s3494_s20 + $0x18] sm:$0xff] %vm2313_vm1, %v3461_v48  ;;  %2316 = vst.msk [vmem:[%s3494_s20 + $0x10] sm:$0xff] %vm2313_vm1, %v3463_v50  ;;  %v2077_v48 = vmul.f32 %v2069_v46, %v2045_v45  ;;  %v2078_v50 = vmul.f32 %v2070_v44, %v2046_v47 }
 0x95f   : > { %2348 = vst.msk [vmem:[%s3494_s20] sm:$0xff] %vm2347_vm4, %v3471_v59 }
 0x960   : > { %2369 = vst.msk [vmem:[%s3494_s20] sm:$0xff] %vm2368_vm5, %v3489_v18  ;;  %2806 = vmatprep.mubr.msk.f32.mxu1 %vm727_vm2, %v2077_v48 }
 0x961   : > { %2334 = vst.msk [vmem:[%s3494_s20 + $0x18] sm:$0xff] %vm2330_vm3, %v3469_v55  ;;  %2333 = vst.msk [vmem:[%s3494_s20 + $0x10] sm:$0xff] %vm2330_vm3, %v3480_v8  ;;  %2807 = vmatmul.mubr.msk.f32.gmra.mxu1 %vm727_vm2, %v2078_v50  ;;  %vm2411_vm2 = vcmask 1048000  }
 0x962   : > { %2386 = vst.msk [vmem:[%s3494_s20] sm:$0xff] %vm2385_vm6, %v2374_v34 }
 0x963   : > { %2351 = vst.msk [vmem:[%s3494_s20 + $0x18] sm:$0xff] %vm2347_vm4, %v3478_v7  ;;  %2350 = vst.msk [vmem:[%s3494_s20 + $0x10] sm:$0xff] %vm2347_vm4, %v3475_v6 }
 0x964   : > { %2372 = vst.msk [vmem:[%s3494_s20 + $0x18] sm:$0xff] %vm2368_vm5, %v2363_v37  ;;  %2371 = vst.msk [vmem:[%s3494_s20 + $0x10] sm:$0xff] %vm2368_vm5, %v2361_v38 }
 0x965   : > { %2389 = vst.msk [vmem:[%s3494_s20 + $0x18] sm:$0xff] %vm2385_vm6, %v2380_v40  ;;  %2388 = vst.msk [vmem:[%s3494_s20 + $0x10] sm:$0xff] %vm2385_vm6, %v2378_v43 }
 0xa0e   : > { %v2805_v51 = vpop.f32.mrf.mxu1 }
 0xa0f   : > { %v2226_v52 = vmul.f32 0.70710677, %v2805_v51  ;;  %v2218_v61 = vmul.f32 0.5, %v2805_v51 }
 0xa10   : > { %v2194_v54 = vpop.f32.mrf.mxu1 }
 0xa11   : > { %3006 = verf.f32 %v2226_v52  ;;  %v2225_v55 = vmul.f32 0.70710677, %v2194_v54  ;;  %v2217_v2 = vmul.f32 0.5, %v2194_v54 }
 0xa13   : > { %3008 = verf.f32 %v2225_v55 }
 0xa1e   : > { %v3007_v59 = vpop.eup %3006 }
 0xa1f   : > { %v2242_v62 = vadd.f32 1.0, %v3007_v59 }
 0xa20   : > { %v3009_v0 = vpop.eup %3008 }
 0xa21   : > { %v2808_v56 = vpop.f32.mrf.mxu1  ;;  %v2250_v1 = vmul.f32 %v2242_v62, %v2218_v61  ;;  %v2241_v3 = vadd.f32 1.0, %v3009_v0 }
 0xa22   : > { %v2228_v58 = vmul.f32 0.70710677, %v2808_v56  ;;  %v2220_v6 = vmul.f32 0.5, %v2808_v56 }
 0xa23   : > { %v2204_v60 = vpop.f32.mrf.mxu1  ;;  %v2249_v4 = vmul.f32 %v2241_v3, %v2217_v2  ;;  %2396 = vrot.lane.b32.xlu0 %v2250_v1, %s3088_s26 }
 0xa24   : > { %3010 = verf.f32 %v2228_v58  ;;  %v2227_v63 = vmul.f32 0.70710677, %v2204_v60  ;;  %v2219_v10 = vmul.f32 0.5, %v2204_v60 }
 0xa25   : > { %2394 = vrot.lane.b32.xlu1 %v2249_v4, %s3088_s26 }
 0xa26   : > { %3012 = verf.f32 %v2227_v63 }
 0xa31   : > { %v3011_v5 = vpop.eup %3010 }
 0xa32   : > { %v2244_v7 = vadd.f32 1.0, %v3011_v5 }
 0xa33   : > { %v3013_v8 = vpop.eup %3012 }
 0xa34   : > { %v2252_v9 = vmul.f32 %v2244_v7, %v2220_v6  ;;  %v2243_v11 = vadd.f32 1.0, %v3013_v8 }
 0xa36   : > { %v2251_v12 = vmul.f32 %v2243_v11, %v2219_v10  ;;  %2400 = vrot.lane.b32.xlu0 %v2252_v9, %s3088_s26 }
 0xa38   : > { %2398 = vrot.lane.b32.xlu1 %v2251_v12, %s3088_s26  ;;  %s3627_s26 = scalar_lea.hbm %s3696_s16, %s2613_s29  ;;  %s3090_s29 = smov [#allocation2]  }
 0xa39   : > { %s3018_s19 = sshll.u32 %s3090_s29, 4  ;;  %s3019_s19 = int_to_ptr.vmem [resolvable:$false] %s3018_s19 }
 0xa3a   : > { %s3020_s18 = scalar_lea.vmem %s3019_s19, 1024  ;;  %p3021_p0 = scmp.lt.s32.totalorder %s3631_s30, %s3019_s19 }
 0xa3b   : > { %p3022_p1 = scmp.lt.s32.totalorder %s3020_s18, %s3014_s23 }
 0xa3d   : > { %p3023_p2 = por %p3022_p1, %p3021_p0 }
 0xa3f   : > { %p3024_p3 = pnand %p3023_p2, %p3017_p13 }
 0xa95   : > { %v2397_v13 = vpop.permute.xlu0 %2396 }
 0xa96   : > { %2408 = vst.msk [vmem:[%s3494_s20 + $0x8] sm:$0xff] %vm2406_vm0, %v2397_v13 }
 0xa97   : > { %2413 = vst.msk [vmem:[%s3494_s20 + $0x8] sm:$0xff] %vm2411_vm2, %v3089_v14  ;;  %v2395_v15 = vpop.permute.xlu1 %2394 }
 0xa98   : > { %2407 = vst.msk [vmem:[%s3494_s20] sm:$0xff] %vm2406_vm0, %v2395_v15 }
 0xa99   : > { %2412 = vst.msk [vmem:[%s3494_s20] sm:$0xff] %vm2411_vm2, %v3089_v14 }
 0xaa8   : > { %v2401_v16 = vpop.permute.xlu0 %2400 }
 0xaa9   : > { %2410 = vst.msk [vmem:[%s3494_s20 + $0x18] sm:$0xff] %vm2406_vm0, %v2401_v16 }
 0xaaa   : > { %2415 = vst.msk [vmem:[%s3494_s20 + $0x18] sm:$0xff] %vm2411_vm2, %v3089_v14  ;;  %v2399_v18 = vpop.permute.xlu1 %2398 }
 0xaab   : > { %2409 = vst.msk [vmem:[%s3494_s20 + $0x10] sm:$0xff] %vm2406_vm0, %v2399_v18 }
 0xaac   : > { %2414 = vst.msk [vmem:[%s3494_s20 + $0x10] sm:$0xff] %vm2411_vm2, %v3089_v14 }
 0xaad   : > { %3027 = shalt.err (!%p3024_p3)
}
 0xaae   : > { %s3028_s28 = scalar_lea.hbm %s3627_s26, 512  ;;  %s3032_s29 = scalar_lea.hbm %s3696_s16, 1024 }
 0xaaf   : > { %p3029_p4 = scmp.ne.s32.totalorder %s3627_s26, %s3028_s28  ;;  %p3033_p9 = scmp.lt.s32.totalorder %s3627_s26, %s3696_s16 }
 0xab0   : > { %p3034_p10 = scmp.lt.s32.totalorder %s3032_s29, %s3028_s28 }
 0xab1   : > { %p3030_p7 = pnand %p3029_p4, %p3215_p5 }
 0xab2   : > { %p3035_p11 = por %p3034_p10, %p3033_p9 }
 0xab3   : > { %p3031_p8 = pneg %p3030_p7 }
 0xab5   : > { %p3036_p12 = pnand %p3035_p11, %p3031_p8 }
 0xab7   : > { %3039 = shalt.err (!%p3036_p12)
}
 0xab8   : > { %s3091_s23 = smov 128   ;;  %s3711_s19 = smov 8  }
 0xab9   : > { %2815 = dma.vmem_to_hbm [thread:$0]  (%p3215_p5), %s3631_s30, 512, %s3627_s26, %s3639_s25, %s3091_s23, %s3091_s23, %s3711_s19  }
 0xaba PF: > { %p2821_p13 = scmp.ge.s32.totalorder %s3074_s24, 2  ;;  %s2445_s1 = sand.u32 1, %s3062_s21  }
 0xabb   : > { %s2446_s2 = scalar_lea.sflag [#allocation3], %s2445_s1 }
 0xabc   : > { %p2818_p0 = pnand %p2821_p13, %p3219_p6 }
 0xabe   : > { %p2819_p1 = pneg %p2818_p0 }
 0xac0   : > { %3057 = dma.done.wait (%p2819_p1), %s2446_s2, 512  }
 0xac1   : > { %3059 = vsyncadd (%p2819_p1), %s2446_s2, 4294966784  ;;  %s3712_s3 = sld [smem:[#allocation5_spill]]  ;;  %p26_p2 = scmp.ge.s32.totalorder %s3202_s27, 4  }
 0xac2   : > { %s3713_s23 = sld [smem:[#allocation6_spill]]  ;;  %s3714_s21 = smov %s3066_s22 }
 0xac3   : > { %s3716_s24 = smov %s3202_s27  ;;  %28 = sbr.rel (!%p26_p2) target bundleno = 8 (0x8), region = 128 }
 0xac7   : > { %s3715_s22 = smov %s3712_s3 }
 0xac8   :  { %2451 = vsyncpa [#allocation3], 1 }
 0xac9   :  { %2453 = vsyncpa [#allocation3 + $0x1], 1 }

</bundles_post_ra>
